<compile_context>
chip_gen: v7x
topology: tpu7x:2x2x1
jax: 0.10.0
libtpu: 0.0.40
codegen_flags: <defaults>
</compile_context>

<pallas_src>
import functools

import jax
import jax.numpy as jnp
from jax.experimental import pallas as pl
from jax.experimental.pallas import tpu as pltpu

_VMEM_LIMIT_BYTES = 64 * 1024 * 1024  # explicit scoped-VMEM cap (>= v5e/v6e defaults)


def _round_up(x, m):
    return ((x + m - 1) // m) * m


# ---------------------------------------------------------------------------
# Kernel 1: tiled conv-as-GEMM   Y = relu(X @ W[sel] + b[sel])   (bf16, f32 acc)
# ---------------------------------------------------------------------------
def _conv_gemm_kernel(idx_ref, x_ref, w_ref, b_ref, o_ref):
    del idx_ref  # consumed only by the BlockSpec index_maps (scalar prefetch)
    y = jnp.dot(x_ref[...], w_ref[0], preferred_element_type=jnp.float32)
    y = jnp.maximum(y + b_ref[0], 0.0)
    o_ref[...] = y.astype(o_ref.dtype)


def conv_gemm(idx, patches, w_stack, b_stack, *, tile_m=512,
              out_dtype=jnp.bfloat16):
    """One conv stage as a tiled GEMM with scalar-prefetched weight selection.

    patches : (M, K) bf16 im2col matrix (combined [shared|attention] channels).
    w_stack : (L, K, Nout) bf16 combined weight stack, selected by idx.
    b_stack : (L, 1, Nout) f32 bias stack.
    idx     : (1,) int32 FSA index (scalar prefetch).
    """
    M, K = patches.shape
    L, Kw, Nout = w_stack.shape
    assert Kw == K, (w_stack.shape, K)

    m16 = _round_up(M, 16)  # bf16 (16,128) sublane tile alignment
    # >=2 M-tiles whenever possible so the "parallel" grid axis can feed both
    # v7x TensorCores; cap at tile_m (big tiles amortize per-step overhead).
    tile_m = min(tile_m, max(16, _round_up(m16 // 2, 16)))
    Mpad = _round_up(M, tile_m)
    if Mpad != M:
        patches = jnp.pad(patches, ((0, Mpad - M), (0, 0)))
    nm = Mpad // tile_m

    out = pl.pallas_call(
        _conv_gemm_kernel,
        out_shape=jax.ShapeDtypeStruct((Mpad, Nout), out_dtype),
        grid_spec=pltpu.PrefetchScalarGridSpec(
            num_scalar_prefetch=1,
            grid=(nm,),
            in_specs=[
                pl.BlockSpec((tile_m, K), lambda i, idx_ref: (i, 0)),
                pl.BlockSpec((1, K, Nout), lambda i, idx_ref: (idx_ref[0], 0, 0)),
                pl.BlockSpec((1, 1, Nout), lambda i, idx_ref: (idx_ref[0], 0, 0)),
            ],
            out_specs=pl.BlockSpec((tile_m, Nout), lambda i, idx_ref: (i, 0)),
        ),
        compiler_params=pltpu.CompilerParams(
            dimension_semantics=("parallel",),
            vmem_limit_bytes=_VMEM_LIMIT_BYTES),
    )(idx, patches, w_stack, b_stack)
    return out[:M]


# ---------------------------------------------------------------------------
# Kernel 2: fused tail  (conv3 GEMM -> flatten -> attn Linear+Softmax -> mask
#                        multiply -> fc1+ReLU -> per-FSA final Linear)
# All intermediates live in VMEM; head matmuls use bf16 operands, f32 acc.
# ---------------------------------------------------------------------------
def _tail_kernel(idx_ref, p3_ref, w3_ref, b3_ref, afc_w_ref, afc_b_ref,
                 fc1_w_ref, fc1_b_ref, fin_w_ref, fin_b_ref, o_ref, *, P, btile):
    del idx_ref
    K3 = p3_ref.shape[-1]

    # conv3 as a GEMM on the combined [shared64 | attn64] channel layout.
    if P == 1:
        p3 = p3_ref[0]
    else:
        p3 = p3_ref[...].reshape(P * btile, K3)
    a3 = jnp.dot(p3, w3_ref[0], preferred_element_type=jnp.float32) + b3_ref[0]
    a3 = jnp.maximum(a3, 0.0)                      # (P*btile, 128) f32, VMEM

    # Flatten to (btile, S) per trunk.  Rows are p-major, so each spatial
    # position is a contiguous slab and the flatten is a lane-dim concat; the
    # NCHW-flatten permutation is folded into afc_w / fc1_w at init.
    if P == 1:
        conv_flat = a3[:, 0:64]
        attn_flat = a3[:, 64:128]
    else:
        conv_flat = jnp.concatenate(
            [a3[p * btile:(p + 1) * btile, 0:64] for p in range(P)], axis=1)
        attn_flat = jnp.concatenate(
            [a3[p * btile:(p + 1) * btile, 64:128] for p in range(P)], axis=1)

    # Attention branch head: Linear(S, S) + Softmax(dim=1).
    logits = jnp.dot(attn_flat.astype(jnp.bfloat16), afc_w_ref[0],
                     preferred_element_type=jnp.float32) + afc_b_ref[0]
    logits = logits - jnp.max(logits, axis=-1, keepdims=True)
    e = jnp.exp(logits)
    mask = e * pl.reciprocal(jnp.sum(e, axis=-1, keepdims=True), approx=True)

    # fc: Linear(S, 512) + ReLU on the masked conv features.
    h = jnp.dot((conv_flat * mask).astype(jnp.bfloat16), fc1_w_ref[...],
                preferred_element_type=jnp.float32) + fc1_b_ref[...]
    h = jnp.maximum(h, 0.0)

    # Per-FSA final Linear(512, n_actions), padded to 128 lanes.
    o_ref[...] = jnp.dot(h.astype(jnp.bfloat16), fin_w_ref[0],
                         preferred_element_type=jnp.float32) + fin_b_ref[0]


def tail_forward(idx, p3, params):
    P, Nr, K3 = p3.shape
    S = params['afc_w'].shape[-1]
    btile = min(Nr, 128)
    nb = Nr // btile
    # TODO(synk): at production S (e.g. 3136 for 84x84 inputs) add a K-tile grid
    #             axis over the afc/fc1 reduction (accumulate logits in VMEM
    #             scratch) so the large bf16 weights are pipelined instead of
    #             fully resident; at demo sizes everything fits comfortably.
    return pl.pallas_call(
        functools.partial(_tail_kernel, P=P, btile=btile),
        out_shape=jax.ShapeDtypeStruct((Nr, 128), jnp.float32),
        grid_spec=pltpu.PrefetchScalarGridSpec(
            num_scalar_prefetch=1,
            grid=(nb,),
            in_specs=[
                pl.BlockSpec((P, btile, K3), lambda i, idx_ref: (0, i, 0)),
                pl.BlockSpec((1, K3, 128), lambda i, idx_ref: (idx_ref[0], 0, 0)),
                pl.BlockSpec((1, 1, 128), lambda i, idx_ref: (idx_ref[0], 0, 0)),
                pl.BlockSpec((1, S, S), lambda i, idx_ref: (idx_ref[0], 0, 0)),
                pl.BlockSpec((1, 1, S), lambda i, idx_ref: (idx_ref[0], 0, 0)),
                pl.BlockSpec((S, 512), lambda i, idx_ref: (0, 0)),
                pl.BlockSpec((1, 512), lambda i, idx_ref: (0, 0)),
                pl.BlockSpec((1, 512, 128), lambda i, idx_ref: (idx_ref[0], 0, 0)),
                pl.BlockSpec((1, 1, 128), lambda i, idx_ref: (idx_ref[0], 0, 0)),
            ],
            out_specs=pl.BlockSpec((btile, 128), lambda i, idx_ref: (i, 0)),
        ),
        compiler_params=pltpu.CompilerParams(
            dimension_semantics=("parallel",),
            vmem_limit_bytes=_VMEM_LIMIT_BYTES),
    )(idx, p3, params['w3_stack'], params['b3_stack'],
      params['afc_w'], params['afc_b'], params['fc1_w'], params['fc1_b'],
      params['fin_w_stack'], params['fin_b_stack'])


# ---------------------------------------------------------------------------
# Glue: im2col patch extraction (data movement only, kept in bf16)
# ---------------------------------------------------------------------------
def _im2col(x, k, s):
    """(N,H,W,C) -> (N,OH,OW,k*k*C); tap-major, channel-minor K ordering."""
    N, H, W, C = x.shape
    OH = (H - k) // s + 1
    OW = (W - k) // s + 1
    cols = [x[:, ky:ky + s * OH:s, kx:kx + s * OW:s, :]
            for ky in range(k) for kx in range(k)]
    p = jnp.stack(cols, axis=3)                    # (N, OH, OW, k*k, C)
    return p.reshape(N, OH, OW, k * k * C)


# ---------------------------------------------------------------------------
# Parameter construction (deterministic, matches the module's layer shapes)
# ---------------------------------------------------------------------------
def _conv_dims(H, W):
    OH1, OW1 = (H - 8) // 4 + 1, (W - 8) // 4 + 1
    OH2, OW2 = (OH1 - 4) // 2 + 1, (OW1 - 4) // 2 + 1
    OH3, OW3 = (OH2 - 3) // 1 + 1, (OW2 - 3) // 1 + 1
    return (OH1, OW1), (OH2, OW2), (OH3, OW3)


def init_params(key, in_ch, n_actions, fsa_nvec, H, W):
    L = 1
    for r in fsa_nvec:
        L *= int(r)
    _, _, (OH3, OW3) = _conv_dims(H, W)
    S = 64 * OH3 * OW3
    sc = 0.05
    ks = jax.random.split(key, 18)

    def rnd(k, shape):
        return sc * jax.random.normal(k, shape, jnp.float32)

    # Raw parameters (HWIO conv weights, PyTorch-equivalent layer shapes).
    w1 = rnd(ks[0], (8, 8, in_ch, 32)); b1 = rnd(ks[1], (32,))
    w2 = rnd(ks[2], (4, 4, 32, 64));    b2 = rnd(ks[3], (64,))
    w3 = rnd(ks[4], (3, 3, 64, 64));    b3 = rnd(ks[5], (64,))
    fc1_w = rnd(ks[6], (S, 512));       fc1_b = rnd(ks[7], (512,))
    aw1 = rnd(ks[8],  (L, 8, 8, in_ch, 32)); ab1 = rnd(ks[9],  (L, 32))
    aw2 = rnd(ks[10], (L, 4, 4, 32, 64));    ab2 = rnd(ks[11], (L, 64))
    aw3 = rnd(ks[12], (L, 3, 3, 64, 64));    ab3 = rnd(ks[13], (L, 64))
    afc_w = rnd(ks[14], (L, S, S));          afc_b = rnd(ks[15], (L, S))
    fin_w = rnd(ks[16], (L, 512, n_actions)); fin_b = rnd(ks[17], (L, n_actions))

    K1 = 8 * 8 * in_ch
    inv256 = jnp.float32(1.0 / 256.0)

    # conv1: both trunks from ONE patch matrix; cols 0:32 shared, 32:64 attn[l];
    # the /256 input scale is folded into the weights (exact for uint8 input).
    w1s = jnp.zeros((L, K1, 64), jnp.float32)
    w1s = w1s.at[:, :, 0:32].set((w1 * inv256).reshape(K1, 32))
    w1s = w1s.at[:, :, 32:64].set((aw1 * inv256).reshape(L, K1, 32))
    b1s = jnp.zeros((L, 1, 64), jnp.float32)
    b1s = b1s.at[:, 0, 0:32].set(b1)
    b1s = b1s.at[:, 0, 32:64].set(ab1)

    # conv2 on the combined [shared32 | attn32] layout: block-diagonal weights
    # (K2 = 16*64 = 1024, lane aligned; output 128-wide, fully used).
    w2s = jnp.zeros((L, 16, 64, 128), jnp.float32)
    w2s = w2s.at[:, :, 0:32, 0:64].set(w2.reshape(16, 32, 64))
    w2s = w2s.at[:, :, 32:64, 64:128].set(aw2.reshape(L, 16, 32, 64))
    w2s = w2s.reshape(L, 16 * 64, 128)
    b2s = jnp.zeros((L, 1, 128), jnp.float32)
    b2s = b2s.at[:, 0, 0:64].set(b2)
    b2s = b2s.at[:, 0, 64:128].set(ab2)

    # conv3 on the combined [shared64 | attn64] layout (K3 = 9*128 = 1152).
    w3s = jnp.zeros((L, 9, 128, 128), jnp.float32)
    w3s = w3s.at[:, :, 0:64, 0:64].set(w3.reshape(9, 64, 64))
    w3s = w3s.at[:, :, 64:128, 64:128].set(aw3.reshape(L, 9, 64, 64))
    w3s = w3s.reshape(L, 9 * 128, 128)
    b3s = jnp.zeros((L, 1, 128), jnp.float32)
    b3s = b3s.at[:, 0, 0:64].set(b3)
    b3s = b3s.at[:, 0, 64:128].set(ab3)

    # Head weights.  The S axis of afc_w/afc_b/fc1_w is stored in the kernel's
    # natural (oy, ox, channel) flatten order; loading real PyTorch weights
    # would require permuting by pi((oy*OW3+ox)*64+c) = c*OH3*OW3 + oy*OW3 + ox
    # (rows AND columns for afc_w, rows for fc1_w).  Random init -> no-op here.
    fin_w_stack = jnp.zeros((L, 512, 128), jnp.float32)
    fin_w_stack = fin_w_stack.at[:, :, 0:n_actions].set(fin_w)
    fin_b_stack = jnp.zeros((L, 1, 128), jnp.float32)
    fin_b_stack = fin_b_stack.at[:, 0, 0:n_actions].set(fin_b)

    bf = jnp.bfloat16
    return dict(
        w1_stack=w1s.astype(bf), b1_stack=b1s,
        w2_stack=w2s.astype(bf), b2_stack=b2s,
        w3_stack=w3s.astype(bf), b3_stack=b3s,
        afc_w=afc_w.astype(bf), afc_b=afc_b.reshape(L, 1, S),
        fc1_w=fc1_w.astype(bf), fc1_b=fc1_b.reshape(1, 512),
        fin_w_stack=fin_w_stack.astype(bf), fin_b_stack=fin_b_stack,
    )


# ---------------------------------------------------------------------------
# Forward pass (mirrors FSADQNIndexATTN.forward)
# ---------------------------------------------------------------------------
def make_forward(fsa_nvec, n_actions):
    radices = [int(r) for r in fsa_nvec]

    @jax.jit
    def forward(params, image_u8, logic):
        N = image_u8.shape[0]
        # fx = im.float()/256 -> scale folded into conv1 weights; NCHW -> NHWC bf16.
        x = jnp.transpose(image_u8, (0, 2, 3, 1)).astype(jnp.bfloat16)

        # fsa_map index from logic[0] (itertools.product ordering == mixed
        # radix, last dim fastest).  Uses batch element 0 only, like the ref.
        lvec = logic[0].reshape(-1).astype(jnp.int32)
        idx = jnp.int32(0)
        for i, r in enumerate(radices):
            idx = idx * jnp.int32(r) + lvec[i]
        idx = idx.reshape(1)

        # conv1: shared + selected attention trunk from one shared patch matrix.
        # TODO(synk): im2col is still XLA glue; in-kernel band DMA + pl.ds
        #             windows would remove the remaining k*k HBM blow-up.
        p1 = _im2col(x, 8, 4)
        _, OH1, OW1, K1 = p1.shape
        a1 = conv_gemm(idx, p1.reshape(N * OH1 * OW1, K1),
                       params['w1_stack'], params['b1_stack'])
        a1 = a1.reshape(N, OH1, OW1, 64)            # [shared32 | attn32]

        # conv2: both trunks in one lane-dense GEMM (block-diagonal weights).
        p2 = _im2col(a1, 4, 2)
        _, OH2, OW2, K2 = p2.shape
        a2 = conv_gemm(idx, p2.reshape(N * OH2 * OW2, K2),
                       params['w2_stack'], params['b2_stack'])
        a2 = a2.reshape(N, OH2, OW2, 128)           # [shared64 | attn64]

        # conv3 + attention softmax + mask + fc1 + per-FSA head: fused kernel.
        # Patch rows are laid out p-major (spatial outer, batch inner) so the
        # in-kernel flatten is a concat of contiguous slabs; the NCHW-flatten
        # permutation is folded into the head weights at init.
        # TODO(synk): conv2 could be folded into this kernel once im2col moves
        #             in-kernel (a2 is small enough to live in VMEM).
        p3 = _im2col(a2, 3, 1)
        _, OH3, OW3, K3 = p3.shape
        P = OH3 * OW3
        Nr = _round_up(N, 16)
        p3 = jnp.pad(p3, ((0, Nr - N), (0, 0), (0, 0), (0, 0)))
        p3 = jnp.transpose(p3, (1, 2, 0, 3)).reshape(P, Nr, K3)

        out = tail_forward(idx, p3, params)
        return out[:N, :n_actions]

    return forward


if __name__ == "__main__":
    # Small but valid config: 36 -> 8 -> 3 -> 1 spatial, S = 64, 6 FSA branches.
    B, C_IN, H, W = 2, 4, 36, 36
    N_ACTIONS = 6
    fsa_nvec = [2, 3]

    key = jax.random.PRNGKey(0)
    k_par, k_img, k_log = jax.random.split(key, 3)
    params = init_params(k_par, C_IN, N_ACTIONS, fsa_nvec, H, W)

    image = jax.random.randint(k_img, (B, C_IN, H, W), 0, 256,
                               dtype=jnp.int32).astype(jnp.uint8)
    logic = jnp.stack(
        [jax.random.randint(jax.random.fold_in(k_log, i), (B,), 0, r, dtype=jnp.int32)
         for i, r in enumerate(fsa_nvec)], axis=1)            # (B, len(fsa_nvec))

    forward = make_forward(fsa_nvec, N_ACTIONS)
    out = forward(params, image, logic)
    out = jax.block_until_ready(out)

    assert out.shape == (B, N_ACTIONS), out.shape
    assert out.dtype == jnp.float32
    assert bool(jnp.all(jnp.isfinite(out)))
    print("KERNEL_OK")
</pallas_src>

<mosaic_0001>
module attributes {stable_mosaic.version = 11 : i64} {
  func.func @_conv_gemm_kernel(%arg0: i32, %arg1: memref<1xi32, #tpu.memory_space<smem>>, %arg2: memref<64x256xbf16, #tpu.memory_space<vmem>>, %arg3: memref<1x256x64xbf16, #tpu.memory_space<vmem>>, %arg4: memref<1x1x64xf32, #tpu.memory_space<vmem>>, %arg5: memref<64x64xbf16, #tpu.memory_space<vmem>>) attributes {dimension_semantics = [#tpu.dimension_semantics<parallel>], iteration_bounds = array<i64: 2>, scalar_prefetch = 1 : i64, scratch_operands = 0 : i64, tpu.core_type = #tpu.core_type<tc>, window_params = [{transform_indices = @transform_0, window_bounds = array<i64: 64, 256>}, {transform_indices = @transform_1, window_bounds = array<i64: 1, 256, 64>}, {transform_indices = @transform_2, window_bounds = array<i64: 1, 1, 64>}, {transform_indices = @transform_3, window_bounds = array<i64: 64, 64>}]} {
    %c0 = arith.constant 0 : index
    %c0_0 = arith.constant 0 : index
    %0 = vector.load %arg2[%c0, %c0_0] : memref<64x256xbf16, #tpu.memory_space<vmem>>, vector<64x256xbf16>
    %c0_1 = arith.constant 0 : index
    %c0_2 = arith.constant 0 : index
    %c0_3 = arith.constant 0 : index
    %1 = vector.load %arg3[%c0_1, %c0_2, %c0_3] : memref<1x256x64xbf16, #tpu.memory_space<vmem>>, vector<1x256x64xbf16>
    %2 = vector.shape_cast %1 : vector<1x256x64xbf16> to vector<256x64xbf16>
    %cst = arith.constant dense<0.000000e+00> : vector<64x64xf32>
    %3 = tpu.matmul %0, %2, %cst {dimension_numbers = #tpu.dot_dimension_numbers<[1], [0], [0], [1], [0, 0, 1, 1], [], []>} : vector<64x256xbf16>, vector<256x64xbf16>, vector<64x64xf32> -> vector<64x64xf32>
    %c0_4 = arith.constant 0 : index
    %c0_5 = arith.constant 0 : index
    %c0_6 = arith.constant 0 : index
    %4 = vector.load %arg4[%c0_4, %c0_5, %c0_6] : memref<1x1x64xf32, #tpu.memory_space<vmem>>, vector<1x1x64xf32>
    %5 = vector.shape_cast %4 : vector<1x1x64xf32> to vector<1x64xf32>
    %6 = vector.broadcast %5 : vector<1x64xf32> to vector<64x64xf32>
    %7 = arith.addf %3, %6 : vector<64x64xf32>
    %cst_7 = arith.constant 0.000000e+00 : f32
    %8 = vector.broadcast %cst_7 : f32 to vector<64x64xf32>
    %9 = arith.maximumf %7, %8 : vector<64x64xf32>
    %10 = arith.truncf %9 : vector<64x64xf32> to vector<64x64xbf16>
    %c0_8 = arith.constant 0 : index
    %c0_9 = arith.constant 0 : index
    %11 = vector.load %arg5[%c0_8, %c0_9] : memref<64x64xbf16, #tpu.memory_space<vmem>>, vector<64x64xbf16>
    tpu.vector_store %arg5[%c0_8, %c0_9], %10 {strides = array<i32>} : memref<64x64xbf16, #tpu.memory_space<vmem>>, vector<64x64xbf16>,
    return
  }
  func.func @transform_0(%arg0: i32, %arg1: memref<1xi32, #tpu.memory_space<smem>>) -> (i32, i32) {
    %c0_i32 = arith.constant 0 : i32
    %c0_i32_0 = arith.constant 0 : i32
    return %arg0, %c0_i32 : i32, i32
  }
  func.func @transform_1(%arg0: i32, %arg1: memref<1xi32, #tpu.memory_space<smem>>) -> (i32, i32, i32) {
    %c0 = arith.constant 0 : index
    %0 = memref.load %arg1[%c0] : memref<1xi32, #tpu.memory_space<smem>>
    %c0_i32 = arith.constant 0 : i32
    %c0_i32_0 = arith.constant 0 : i32
    %c0_i32_1 = arith.constant 0 : i32
    return %0, %c0_i32, %c0_i32_0 : i32, i32, i32
  }
  func.func @transform_2(%arg0: i32, %arg1: memref<1xi32, #tpu.memory_space<smem>>) -> (i32, i32, i32) {
    %c0 = arith.constant 0 : index
    %0 = memref.load %arg1[%c0] : memref<1xi32, #tpu.memory_space<smem>>
    %c0_i32 = arith.constant 0 : i32
    %c0_i32_0 = arith.constant 0 : i32
    %c0_i32_1 = arith.constant 0 : i32
    return %0, %c0_i32, %c0_i32_0 : i32, i32, i32
  }
  func.func @transform_3(%arg0: i32, %arg1: memref<1xi32, #tpu.memory_space<smem>>) -> (i32, i32) {
    %c0_i32 = arith.constant 0 : i32
    %c0_i32_0 = arith.constant 0 : i32
    return %arg0, %c0_i32 : i32, i32
  }
}

module attributes {stable_mosaic.version = 11 : i64} {
  func.func @_conv_gemm_kernel(%arg0: i32, %arg1: memref<1xi32, #tpu.memory_space<smem>>, %arg2: memref<16x1024xbf16, #tpu.memory_space<vmem>>, %arg3: memref<1x1024x128xbf16, #tpu.memory_space<vmem>>, %arg4: memref<1x1x128xf32, #tpu.memory_space<vmem>>, %arg5: memref<16x128xbf16, #tpu.memory_space<vmem>>) attributes {dimension_semantics = [#tpu.dimension_semantics<parallel>], iteration_bounds = array<i64: 2>, scalar_prefetch = 1 : i64, scratch_operands = 0 : i64, tpu.core_type = #tpu.core_type<tc>, window_params = [{transform_indices = @transform_0, window_bounds = array<i64: 16, 1024>}, {transform_indices = @transform_1, window_bounds = array<i64: 1, 1024, 128>}, {transform_indices = @transform_2, window_bounds = array<i64: 1, 1, 128>}, {transform_indices = @transform_3, window_bounds = array<i64: 16, 128>}]} {
    %c0 = arith.constant 0 : index
    %c0_0 = arith.constant 0 : index
    %0 = vector.load %arg2[%c0, %c0_0] : memref<16x1024xbf16, #tpu.memory_space<vmem>>, vector<16x1024xbf16>
    %c0_1 = arith.constant 0 : index
    %c0_2 = arith.constant 0 : index
    %c0_3 = arith.constant 0 : index
    %1 = vector.load %arg3[%c0_1, %c0_2, %c0_3] : memref<1x1024x128xbf16, #tpu.memory_space<vmem>>, vector<1x1024x128xbf16>
    %2 = vector.shape_cast %1 : vector<1x1024x128xbf16> to vector<1024x128xbf16>
    %cst = arith.constant dense<0.000000e+00> : vector<16x128xf32>
    %3 = tpu.matmul %0, %2, %cst {dimension_numbers = #tpu.dot_dimension_numbers<[1], [0], [0], [1], [0, 0, 1, 1], [], []>} : vector<16x1024xbf16>, vector<1024x128xbf16>, vector<16x128xf32> -> vector<16x128xf32>
    %c0_4 = arith.constant 0 : index
    %c0_5 = arith.constant 0 : index
    %c0_6 = arith.constant 0 : index
    %4 = vector.load %arg4[%c0_4, %c0_5, %c0_6] : memref<1x1x128xf32, #tpu.memory_space<vmem>>, vector<1x1x128xf32>
    %5 = vector.shape_cast %4 : vector<1x1x128xf32> to vector<1x128xf32>
    %6 = vector.broadcast %5 : vector<1x128xf32> to vector<16x128xf32>
    %7 = arith.addf %3, %6 : vector<16x128xf32>
    %cst_7 = arith.constant 0.000000e+00 : f32
    %8 = vector.broadcast %cst_7 : f32 to vector<16x128xf32>
    %9 = arith.maximumf %7, %8 : vector<16x128xf32>
    %10 = arith.truncf %9 : vector<16x128xf32> to vector<16x128xbf16>
    %c0_8 = arith.constant 0 : index
    %c0_9 = arith.constant 0 : index
    %11 = vector.load %arg5[%c0_8, %c0_9] : memref<16x128xbf16, #tpu.memory_space<vmem>>, vector<16x128xbf16>
    tpu.vector_store %arg5[%c0_8, %c0_9], %10 {strides = array<i32>} : memref<16x128xbf16, #tpu.memory_space<vmem>>, vector<16x128xbf16>,
    return
  }
  func.func @transform_0(%arg0: i32, %arg1: memref<1xi32, #tpu.memory_space<smem>>) -> (i32, i32) {
    %c0_i32 = arith.constant 0 : i32
    %c0_i32_0 = arith.constant 0 : i32
    return %arg0, %c0_i32 : i32, i32
  }
  func.func @transform_1(%arg0: i32, %arg1: memref<1xi32, #tpu.memory_space<smem>>) -> (i32, i32, i32) {
    %c0 = arith.constant 0 : index
    %0 = memref.load %arg1[%c0] : memref<1xi32, #tpu.memory_space<smem>>
    %c0_i32 = arith.constant 0 : i32
    %c0_i32_0 = arith.constant 0 : i32
    %c0_i32_1 = arith.constant 0 : i32
    return %0, %c0_i32, %c0_i32_0 : i32, i32, i32
  }
  func.func @transform_2(%arg0: i32, %arg1: memref<1xi32, #tpu.memory_space<smem>>) -> (i32, i32, i32) {
    %c0 = arith.constant 0 : index
    %0 = memref.load %arg1[%c0] : memref<1xi32, #tpu.memory_space<smem>>
    %c0_i32 = arith.constant 0 : i32
    %c0_i32_0 = arith.constant 0 : i32
    %c0_i32_1 = arith.constant 0 : i32
    return %0, %c0_i32, %c0_i32_0 : i32, i32, i32
  }
  func.func @transform_3(%arg0: i32, %arg1: memref<1xi32, #tpu.memory_space<smem>>) -> (i32, i32) {
    %c0_i32 = arith.constant 0 : i32
    %c0_i32_0 = arith.constant 0 : i32
    return %arg0, %c0_i32 : i32, i32
  }
}

module attributes {stable_mosaic.version = 11 : i64} {
  func.func @_tail_kernel(%arg0: i32, %arg1: memref<1xi32, #tpu.memory_space<smem>>, %arg2: memref<1x16x1152xbf16, #tpu.memory_space<vmem>>, %arg3: memref<1x1152x128xbf16, #tpu.memory_space<vmem>>, %arg4: memref<1x1x128xf32, #tpu.memory_space<vmem>>, %arg5: memref<1x64x64xbf16, #tpu.memory_space<vmem>>, %arg6: memref<1x1x64xf32, #tpu.memory_space<vmem>>, %arg7: memref<64x512xbf16, #tpu.memory_space<vmem>>, %arg8: memref<1x512xf32, #tpu.memory_space<vmem>>, %arg9: memref<1x512x128xbf16, #tpu.memory_space<vmem>>, %arg10: memref<1x1x128xf32, #tpu.memory_space<vmem>>, %arg11: memref<16x128xf32, #tpu.memory_space<vmem>>) attributes {dimension_semantics = [#tpu.dimension_semantics<parallel>], iteration_bounds = array<i64: 1>, scalar_prefetch = 1 : i64, scratch_operands = 0 : i64, tpu.core_type = #tpu.core_type<tc>, window_params = [{transform_indices = @transform_0, window_bounds = array<i64: 1, 16, 1152>}, {transform_indices = @transform_1, window_bounds = array<i64: 1, 1152, 128>}, {transform_indices = @transform_2, window_bounds = array<i64: 1, 1, 128>}, {transform_indices = @transform_3, window_bounds = array<i64: 1, 64, 64>}, {transform_indices = @transform_4, window_bounds = array<i64: 1, 1, 64>}, {pipeline_mode = #tpu.pipeline_mode<synchronous>, transform_indices = @transform_5, window_bounds = array<i64: 64, 512>}, {pipeline_mode = #tpu.pipeline_mode<synchronous>, transform_indices = @transform_6, window_bounds = array<i64: 1, 512>}, {transform_indices = @transform_7, window_bounds = array<i64: 1, 512, 128>}, {transform_indices = @transform_8, window_bounds = array<i64: 1, 1, 128>}, {transform_indices = @transform_9, window_bounds = array<i64: 16, 128>}]} {
    %c0 = arith.constant 0 : index
    %c0_0 = arith.constant 0 : index
    %c0_1 = arith.constant 0 : index
    %0 = vector.load %arg2[%c0, %c0_0, %c0_1] : memref<1x16x1152xbf16, #tpu.memory_space<vmem>>, vector<1x16x1152xbf16>
    %1 = vector.shape_cast %0 : vector<1x16x1152xbf16> to vector<16x1152xbf16>
    %c0_2 = arith.constant 0 : index
    %c0_3 = arith.constant 0 : index
    %c0_4 = arith.constant 0 : index
    %2 = vector.load %arg3[%c0_2, %c0_3, %c0_4] : memref<1x1152x128xbf16, #tpu.memory_space<vmem>>, vector<1x1152x128xbf16>
    %3 = vector.shape_cast %2 : vector<1x1152x128xbf16> to vector<1152x128xbf16>
    %cst = arith.constant dense<0.000000e+00> : vector<16x128xf32>
    %4 = tpu.matmul %1, %3, %cst {dimension_numbers = #tpu.dot_dimension_numbers<[1], [0], [0], [1], [0, 0, 1, 1], [], []>} : vector<16x1152xbf16>, vector<1152x128xbf16>, vector<16x128xf32> -> vector<16x128xf32>
    %c0_5 = arith.constant 0 : index
    %c0_6 = arith.constant 0 : index
    %c0_7 = arith.constant 0 : index
    %5 = vector.load %arg4[%c0_5, %c0_6, %c0_7] : memref<1x1x128xf32, #tpu.memory_space<vmem>>, vector<1x1x128xf32>
    %6 = vector.shape_cast %5 : vector<1x1x128xf32> to vector<1x128xf32>
    %7 = vector.broadcast %6 : vector<1x128xf32> to vector<16x128xf32>
    %8 = arith.addf %4, %7 : vector<16x128xf32>
    %cst_8 = arith.constant 0.000000e+00 : f32
    %9 = vector.broadcast %cst_8 : f32 to vector<16x128xf32>
    %10 = arith.maximumf %8, %9 : vector<16x128xf32>
    %11 = vector.extract_strided_slice %10 {offsets = [0, 0], sizes = [16, 64], strides = [1, 1]} : vector<16x128xf32> to vector<16x64xf32>
    %12 = vector.extract_strided_slice %10 {offsets = [0, 64], sizes = [16, 64], strides = [1, 1]} : vector<16x128xf32> to vector<16x64xf32>
    %13 = arith.truncf %12 : vector<16x64xf32> to vector<16x64xbf16>
    %c0_9 = arith.constant 0 : index
    %c0_10 = arith.constant 0 : index
    %c0_11 = arith.constant 0 : index
    %14 = vector.load %arg5[%c0_9, %c0_10, %c0_11] : memref<1x64x64xbf16, #tpu.memory_space<vmem>>, vector<1x64x64xbf16>
    %15 = vector.shape_cast %14 : vector<1x64x64xbf16> to vector<64x64xbf16>
    %cst_12 = arith.constant dense<0.000000e+00> : vector<16x64xf32>
    %16 = tpu.matmul %13, %15, %cst_12 {dimension_numbers = #tpu.dot_dimension_numbers<[1], [0], [0], [1], [0, 0, 1, 1], [], []>} : vector<16x64xbf16>, vector<64x64xbf16>, vector<16x64xf32> -> vector<16x64xf32>
    %c0_13 = arith.constant 0 : index
    %c0_14 = arith.constant 0 : index
    %c0_15 = arith.constant 0 : index
    %17 = vector.load %arg6[%c0_13, %c0_14, %c0_15] : memref<1x1x64xf32, #tpu.memory_space<vmem>>, vector<1x1x64xf32>
    %18 = vector.shape_cast %17 : vector<1x1x64xf32> to vector<1x64xf32>
    %19 = vector.broadcast %18 : vector<1x64xf32> to vector<16x64xf32>
    %20 = arith.addf %16, %19 : vector<16x64xf32>
    %cst_16 = arith.constant dense<0xFF800000> : vector<16xf32>
    %21 = vector.multi_reduction <maximumf>, %20, %cst_16 [1] : vector<16x64xf32> to vector<16xf32>
    %22 = vector.shape_cast %21 : vector<16xf32> to vector<16x1xf32>
    %23 = vector.broadcast %22 : vector<16x1xf32> to vector<16x64xf32>
    %24 = arith.subf %20, %23 : vector<16x64xf32>
    %25 = math.exp %24 : vector<16x64xf32>
    %cst_17 = arith.constant dense<0.000000e+00> : vector<16xf32>
    %26 = vector.multi_reduction <add>, %25, %cst_17 [1] : vector<16x64xf32> to vector<16xf32>
    %27 = vector.shape_cast %26 : vector<16xf32> to vector<16x1xf32>
    %28 = tpu.reciprocal %27 {approx = true} : vector<16x1xf32> -> vector<16x1xf32>
    %29 = vector.broadcast %28 : vector<16x1xf32> to vector<16x64xf32>
    %30 = arith.mulf %25, %29 : vector<16x64xf32>
    %31 = arith.mulf %11, %30 : vector<16x64xf32>
    %32 = arith.truncf %31 : vector<16x64xf32> to vector<16x64xbf16>
    %c0_18 = arith.constant 0 : index
    %c0_19 = arith.constant 0 : index
    %33 = vector.load %arg7[%c0_18, %c0_19] : memref<64x512xbf16, #tpu.memory_space<vmem>>, vector<64x512xbf16>
    %cst_20 = arith.constant dense<0.000000e+00> : vector<16x512xf32>
    %34 = tpu.matmul %32, %33, %cst_20 {dimension_numbers = #tpu.dot_dimension_numbers<[1], [0], [0], [1], [0, 0, 1, 1], [], []>} : vector<16x64xbf16>, vector<64x512xbf16>, vector<16x512xf32> -> vector<16x512xf32>
    %c0_21 = arith.constant 0 : index
    %c0_22 = arith.constant 0 : index
    %35 = vector.load %arg8[%c0_21, %c0_22] : memref<1x512xf32, #tpu.memory_space<vmem>>, vector<1x512xf32>
    %36 = vector.broadcast %35 : vector<1x512xf32> to vector<16x512xf32>
    %37 = arith.addf %34, %36 : vector<16x512xf32>
    %cst_23 = arith.constant 0.000000e+00 : f32
    %38 = vector.broadcast %cst_23 : f32 to vector<16x512xf32>
    %39 = arith.maximumf %37, %38 : vector<16x512xf32>
    %40 = arith.truncf %39 : vector<16x512xf32> to vector<16x512xbf16>
    %c0_24 = arith.constant 0 : index
    %c0_25 = arith.constant 0 : index
    %c0_26 = arith.constant 0 : index
    %41 = vector.load %arg9[%c0_24, %c0_25, %c0_26] : memref<1x512x128xbf16, #tpu.memory_space<vmem>>, vector<1x512x128xbf16>
    %42 = vector.shape_cast %41 : vector<1x512x128xbf16> to vector<512x128xbf16>
    %cst_27 = arith.constant dense<0.000000e+00> : vector<16x128xf32>
    %43 = tpu.matmul %40, %42, %cst_27 {dimension_numbers = #tpu.dot_dimension_numbers<[1], [0], [0], [1], [0, 0, 1, 1], [], []>} : vector<16x512xbf16>, vector<512x128xbf16>, vector<16x128xf32> -> vector<16x128xf32>
    %c0_28 = arith.constant 0 : index
    %c0_29 = arith.constant 0 : index
    %c0_30 = arith.constant 0 : index
    %44 = vector.load %arg10[%c0_28, %c0_29, %c0_30] : memref<1x1x128xf32, #tpu.memory_space<vmem>>, vector<1x1x128xf32>
    %45 = vector.shape_cast %44 : vector<1x1x128xf32> to vector<1x128xf32>
    %46 = vector.broadcast %45 : vector<1x128xf32> to vector<16x128xf32>
    %47 = arith.addf %43, %46 : vector<16x128xf32>
    %c0_31 = arith.constant 0 : index
    %c0_32 = arith.constant 0 : index
    %48 = vector.load %arg11[%c0_31, %c0_32] : memref<16x128xf32, #tpu.memory_space<vmem>>, vector<16x128xf32>
    tpu.vector_store %arg11[%c0_31, %c0_32], %47 {strides = array<i32>} : memref<16x128xf32, #tpu.memory_space<vmem>>, vector<16x128xf32>,
    return
  }
  func.func @transform_0(%arg0: i32, %arg1: memref<1xi32, #tpu.memory_space<smem>>) -> (i32, i32, i32) {
    %c0_i32 = arith.constant 0 : i32
    %c0_i32_0 = arith.constant 0 : i32
    %c0_i32_1 = arith.constant 0 : i32
    return %c0_i32, %arg0, %c0_i32_0 : i32, i32, i32
  }
  func.func @transform_1(%arg0: i32, %arg1: memref<1xi32, #tpu.memory_space<smem>>) -> (i32, i32, i32) {
    %c0 = arith.constant 0 : index
    %0 = memref.load %arg1[%c0] : memref<1xi32, #tpu.memory_space<smem>>
    %c0_i32 = arith.constant 0 : i32
    %c0_i32_0 = arith.constant 0 : i32
    %c0_i32_1 = arith.constant 0 : i32
    return %0, %c0_i32, %c0_i32_0 : i32, i32, i32
  }
  func.func @transform_2(%arg0: i32, %arg1: memref<1xi32, #tpu.memory_space<smem>>) -> (i32, i32, i32) {
    %c0 = arith.constant 0 : index
    %0 = memref.load %arg1[%c0] : memref<1xi32, #tpu.memory_space<smem>>
    %c0_i32 = arith.constant 0 : i32
    %c0_i32_0 = arith.constant 0 : i32
    %c0_i32_1 = arith.constant 0 : i32
    return %0, %c0_i32, %c0_i32_0 : i32, i32, i32
  }
  func.func @transform_3(%arg0: i32, %arg1: memref<1xi32, #tpu.memory_space<smem>>) -> (i32, i32, i32) {
    %c0 = arith.constant 0 : index
    %0 = memref.load %arg1[%c0] : memref<1xi32, #tpu.memory_space<smem>>
    %c0_i32 = arith.constant 0 : i32
    %c0_i32_0 = arith.constant 0 : i32
    %c0_i32_1 = arith.constant 0 : i32
    return %0, %c0_i32, %c0_i32_0 : i32, i32, i32
  }
  func.func @transform_4(%arg0: i32, %arg1: memref<1xi32, #tpu.memory_space<smem>>) -> (i32, i32, i32) {
    %c0 = arith.constant 0 : index
    %0 = memref.load %arg1[%c0] : memref<1xi32, #tpu.memory_space<smem>>
    %c0_i32 = arith.constant 0 : i32
    %c0_i32_0 = arith.constant 0 : i32
    %c0_i32_1 = arith.constant 0 : i32
    return %0, %c0_i32, %c0_i32_0 : i32, i32, i32
  }
  func.func @transform_5(%arg0: i32, %arg1: memref<1xi32, #tpu.memory_space<smem>>) -> (i32, i32) {
    %c0_i32 = arith.constant 0 : i32
    %c0_i32_0 = arith.constant 0 : i32
    %c0_i32_1 = arith.constant 0 : i32
    return %c0_i32, %c0_i32_0 : i32, i32
  }
  func.func @transform_6(%arg0: i32, %arg1: memref<1xi32, #tpu.memory_space<smem>>) -> (i32, i32) {
    %c0_i32 = arith.constant 0 : i32
    %c0_i32_0 = arith.constant 0 : i32
    %c0_i32_1 = arith.constant 0 : i32
    return %c0_i32, %c0_i32_0 : i32, i32
  }
  func.func @transform_7(%arg0: i32, %arg1: memref<1xi32, #tpu.memory_space<smem>>) -> (i32, i32, i32) {
    %c0 = arith.constant 0 : index
    %0 = memref.load %arg1[%c0] : memref<1xi32, #tpu.memory_space<smem>>
    %c0_i32 = arith.constant 0 : i32
    %c0_i32_0 = arith.constant 0 : i32
    %c0_i32_1 = arith.constant 0 : i32
    return %0, %c0_i32, %c0_i32_0 : i32, i32, i32
  }
  func.func @transform_8(%arg0: i32, %arg1: memref<1xi32, #tpu.memory_space<smem>>) -> (i32, i32, i32) {
    %c0 = arith.constant 0 : index
    %0 = memref.load %arg1[%c0] : memref<1xi32, #tpu.memory_space<smem>>
    %c0_i32 = arith.constant 0 : i32
    %c0_i32_0 = arith.constant 0 : i32
    %c0_i32_1 = arith.constant 0 : i32
    return %0, %c0_i32, %c0_i32_0 : i32, i32, i32
  }
  func.func @transform_9(%arg0: i32, %arg1: memref<1xi32, #tpu.memory_space<smem>>) -> (i32, i32) {
    %c0_i32 = arith.constant 0 : i32
    %c0_i32_0 = arith.constant 0 : i32
    return %arg0, %c0_i32 : i32, i32
  }
}

</mosaic_0001>

<bundles_post_ra>
// kernel: forward.3
= control target key start
LH: loop header
LB: loop body
LE: loop exit
PB: predicated region body
PF: predicated region fallthrough
CT: control target
= control target key end

     0   :  { %s1486_s0 = inlined_call_operand.<no memory space> [shape: s32[1], index: 0, kind: input, shape index: {}]   ;;  %s1487_s1 = inlined_call_operand.hbm [shape: bf16[128,256], index: 1, kind: input, shape index: {}]   ;;  %s1488_s2 = inlined_call_operand.hbm [shape: bf16[6,256,64], index: 2, kind: input, shape index: {}]   ;;  %s1489_s3 = inlined_call_operand.hbm [shape: f32[6,1,64], index: 3, kind: input, shape index: {}]   ;;  %s1490_s4 = inlined_call_operand.hbm [shape: bf16[128,64], index: 4, kind: output, shape index: {}]  }
   0x1   :  { %1500 = sst [smem:[#allocation15_spill]] %s1488_s2 }
   0x2   :  { %9 = sst [smem:[#allocation3]] %s1486_s0 }
   0x3   :  { %10 = vsyncpa [#allocation5], 0 }
   0x4   :  { %12 = vsyncpa [#allocation5 + $0x1], 0 }
   0x5   :  { %13 = vsyncpa [#allocation8], 0 }
   0x6   :  { %14 = vsyncpa [#allocation6], 0 }
   0x7   :  { %16 = vsyncpa [#allocation6 + $0x1], 0  ;;  %s1156_s17 = smov 0   ;;  %s1158_s18 = smov 0  }
   0x8   :  { %s1160_s19 = smov 0   ;;  %s1162_s20 = smov 0  }
   0x9   :  { %s1164_s21 = smov 0   ;;  %s1166_s22 = smov 0  }
   0xa   :  { %s1168_s23 = smov 0   ;;  %s1170_s0 = smov 0  }
   0xb LB: > { %s1195_s24 = sadd.s32 4294967295, %s1116_s0   ;;  %s1197_s25 = sld [smem:[#allocation3]]  ;;  %s1116_s0 = sphi %s1170_s0, %s1528_s0   ;;  %s1112_s23 = sphi %s1168_s23, %s1527_s23   ;;  %s1108_s22 = sphi %s1166_s22, %s1526_s22   ;;  %s1104_s21 = sphi %s1164_s21, %s1525_s21   ;;  %s1100_s20 = sphi %s1162_s20, %s1472_s20   ;;  %s1096_s19 = sphi %s1160_s19, %s1524_s19   ;;  %s1092_s18 = sphi %s1158_s18, %s1467_s18   ;;  %s1088_s17 = sphi %s1156_s17, %s1523_s17  }
   0xc   : > { %p1492_p0 = scmp.eq.s32.totalorder %s1195_s24, 0  ;;  %p70_p1 = scmp.ne.s32.totalorder %s1100_s20, %s1096_s19 }
   0xd   : > { %p653_p3 = scmp.ge.s32.totalorder %s1116_s0, 1  ;;  %p135_p5 = scmp.lt.s32.totalorder %s1116_s0, 3 }
   0xe   : > { %p1205_p4 = por %p70_p1, %p1492_p0  ;;  %s1503_s2 = sld [smem:[#allocation15_spill]] }
   0xf   : > { %p1210_p6 = pnand %p653_p3, %p135_p5  ;;  %s1118_s6 = smov [#allocation7]  }
  0x10   : > { %s1501_s26 = scalar_select %p1205_p4, 1, 0 }
  0x11   : > { %s1502_s27 = scalar_select %p1210_p6, 1, 0 }
  0x12   : > { %s703_s28 = sshll.u32 %s1197_s25, 11  ;;  %p1491_p7 = pneg %p1210_p6 }
  0x13   : > { %s151_s7 = sshll.u32 %s1118_s6, 4  ;;  %s1231_s7 = int_to_ptr.vmem [resolvable:$true] %s151_s7 }
  0x14   : > { %s1220_s5 = scalar_lea.hbm %s1503_s2, %s703_s28  ;;  %p1227_p8 = pnand %p1491_p7, %p1205_p4 }
  0x15   : > { %s912_s9 = scalar_lea.hbm %s1220_s5, 2048  ;;  %s917_s12 = scalar_lea.hbm %s1503_s2, 12288 }
  0x16   : > { %p913_p10 = scmp.ne.s32.totalorder %s1220_s5, %s912_s9  ;;  %p914_p11 = pneg %p1227_p8 }
  0x17   : > { %p918_p1 = scmp.lt.u32.totalorder %s1220_s5, %s1503_s2  ;;  %p919_p3 = scmp.lt.u32.totalorder %s917_s12, %s912_s9 }
  0x18   : > { %p915_p12 = pnand %p914_p11, %p913_p10  ;;  %p921_p2 = scmp.lt.u32.totalorder %s912_s9, %s1220_s5 }
  0x19   : > { %p920_p5 = por %p919_p3, %p918_p1 }
  0x1a   : > { %p916_p13 = pneg %p915_p12 }
  0x1b   : > { %p922_p9 = por %p921_p2, %p920_p5 }
  0x1d   : > { %p923_p7 = pnand %p922_p9, %p916_p13 }
  0x1f   : > { %926 = shalt.err (!%p923_p7)
}
  0x20   : > { %s927_s15 = scalar_lea.vmem %s1231_s7, 2048  ;;  %p935_p4 = scmp.lt.s32.totalorder %s1231_s7, %s1231_s7 }
  0x21   : > { %p928_p10 = scmp.ne.s32.totalorder %s1231_s7, %s927_s15  ;;  %p936_p6 = scmp.lt.s32.totalorder %s927_s15, %s927_s15 }
  0x23   : > { %p930_p12 = pnand %p928_p10, %p914_p11  ;;  %p937_p1 = por %p936_p6, %p935_p4 }
  0x25   : > { %p931_p0 = pneg %p930_p12 }
  0x27   : > { %p938_p3 = pnand %p937_p1, %p931_p0 }
  0x29   : > { %941 = shalt.err (!%p938_p3)
}
  0x2a   : > { %s1119_s16 = smov 64   ;;  %s1120_s19 = smov 4  }
  0x2b   : > { %782 = dma.hbm_to_vmem [thread:$0]  (!%p1227_p8), %s1220_s5, 2048, %s1231_s7, [#allocation8], %s1119_s16, %s1119_s16, %s1120_s19  }
  0x2c   : > { %p98_p2 = scmp.ne.s32.totalorder %s1092_s18, %s1088_s17  ;;  %s656_s28 = sshll.u32 %s1197_s25, 4 }
  0x2d   : > { %s1266_s6 = scalar_lea.hbm %s1489_s3, %s656_s28  ;;  %p1505_p0 = scmp.eq.s32.totalorder %s1195_s24, 0 }
  0x2e   : > { %s1121_s10 = smov [#allocation9]   ;;  %p1507_p6 = scmp.ne.s32.totalorder %s1502_s27, 0 }
  0x2f   : > { %p1270_p4 = por %p98_p2, %p1505_p0  ;;  %s168_s8 = sshll.u32 %s1121_s10, 4  ;;  %s169_s8 = int_to_ptr.vmem [resolvable:$true] %s168_s8 }
  0x30   : > { %p1508_p7 = pneg %p1507_p6  ;;  %s942_s25 = scalar_lea.hbm %s1266_s6, 16 }
  0x31   : > { %s1506_s9 = scalar_select %p1270_p4, 1, 0 }
  0x32   : > { %p1279_p8 = pnand %p1508_p7, %p1270_p4  ;;  %p943_p9 = scmp.ne.s32.totalorder %s1266_s6, %s942_s25 }
  0x33   : > { %s947_s11 = scalar_lea.hbm %s1489_s3, 96  ;;  %p948_p10 = scmp.lt.u32.totalorder %s1266_s6, %s1489_s3 }
  0x34   : > { %p944_p11 = pneg %p1279_p8  ;;  %p949_p12 = scmp.lt.u32.totalorder %s947_s11, %s942_s25 }
  0x35   : > { %p951_p3 = scmp.lt.u32.totalorder %s942_s25, %s1266_s6 }
  0x36   : > { %p945_p13 = pnand %p944_p11, %p943_p9  ;;  %p950_p1 = por %p949_p12, %p948_p10 }
  0x38   : > { %p946_p5 = pneg %p945_p13  ;;  %p952_p2 = por %p951_p3, %p950_p1 }
  0x3a   : > { %p953_p0 = pnand %p952_p2, %p946_p5 }
  0x3c   : > { %956 = shalt.err (!%p953_p0)
}
  0x3d   : > { %s957_s14 = scalar_lea.vmem %s169_s8, 16  ;;  %s964_s15 = scalar_lea.vmem %s169_s8, 32 }
  0x3e   : > { %p958_p7 = scmp.ne.s32.totalorder %s169_s8, %s957_s14  ;;  %p965_p4 = scmp.lt.s32.totalorder %s169_s8, %s169_s8 }
  0x3f   : > { %p966_p6 = scmp.lt.s32.totalorder %s964_s15, %s957_s14 }
  0x40   : > { %p960_p9 = pnand %p958_p7, %p944_p11 }
  0x41   : > { %p967_p10 = por %p966_p6, %p965_p4 }
  0x42   : > { %p961_p13 = pneg %p960_p9 }
  0x44   : > { %p968_p12 = pnand %p967_p10, %p961_p13 }
  0x46   : > { %971 = shalt.err (!%p968_p12)
}
  0x47   : > { %785 = dma.hbm_to_vmem [thread:$0]  (!%p1279_p8), %s1266_s6, 16, %s169_s8, [#allocation8]  }
  0x48   : > { %s652_s16 = sadd.s32 4294967294, %s1116_s0   ;;  %s1306_s19 = sadd.s32 1, %s1116_s0  }
  0x49   : > { %s29_s28 = sadd.s32 1, %s1112_s23  ;;  %s26_s29 = ssub.s32 %s1116_s0, %s1306_s19 }
  0x4a   : > { %p36_p4 = scmp.ne.s32.totalorder %s1112_s23, %s1108_s22  ;;  %p27_p6 = scmp.eq.s32.totalorder %s26_s29, 0 }
  0x4b   : > { %p37_p11 = scmp.eq.s32.totalorder %s1116_s0, 0  ;;  %p42_p5 = scmp.ne.s32.totalorder %s1108_s22, %s1104_s21 }
  0x4c   : > { %p1510_p1 = scmp.eq.s32.totalorder %s1195_s24, 1  ;;  %p1512_p8 = scmp.eq.s32.totalorder %s1195_s24, 0 }
  0x4d   : > { %s1323_s10 = scalar_select %p27_p6, %s1112_s23, %s29_s28  }
  0x4e   : > { %p1318_p3 = por %p1510_p1, %p36_p4  ;;  %p38_p2 = por %p37_p11, %p36_p4 }
  0x4f   : > { %p1327_p0 = por %p1512_p8, %p42_p5  ;;  %p128_p7 = scmp.eq.s32.totalorder %s652_s16, 1 }
  0x50   : > { %s1511_s30 = scalar_select %p1318_p3, 1, 0 }
  0x51   : > { %p794_p9 = scmp.lt.s32.totalorder %s1116_s0, 2  ;;  %s179_s8 = sand.u32 1, %s1112_s23  }
  0x52   : > { %s705_s17 = sshll.u32 %s1116_s0, 10  ;;  %p1334_p13 = por %p128_p7, %p42_p5 }
  0x53   : > { %s658_s5 = sshll.u32 %s179_s8, 6  ;;  %s1341_s12 = scalar_lea.hbm %s1487_s1, %s705_s17 }
  0x54   : > { %s1514_s25 = scalar_select %p1334_p13, 1, 0 }
  0x55   : > { %p1343_p10 = pnand %p794_p9, %p38_p2  ;;  %s183_s14 = scalar_lea.vmem [#allocation4], %s658_s5 }
  0x56   : > { %s191_s15 = sshll.u32 %s183_s14, 4  ;;  %s1349_s16 = scalar_lea.sflag [#allocation5], %s179_s8  ;;  %s1347_s15 = int_to_ptr.vmem [resolvable:$true] %s191_s15 }
  0x57   : > { %s972_s28 = scalar_lea.hbm %s1341_s12, 1024  ;;  %p974_p4 = pneg %p1343_p10 }
  0x58   : > { %p973_p12 = scmp.ne.s32.totalorder %s1341_s12, %s972_s28  ;;  %s977_s7 = scalar_lea.hbm %s1487_s1, 2048 }
  0x59   : > { %p978_p5 = scmp.lt.u32.totalorder %s1341_s12, %s1487_s1  ;;  %p979_p1 = scmp.lt.u32.totalorder %s977_s7, %s972_s28 }
  0x5a   : > { %p975_p6 = pnand %p974_p4, %p973_p12  ;;  %p981_p8 = scmp.lt.u32.totalorder %s972_s28, %s1341_s12 }
  0x5b   : > { %p980_p2 = por %p979_p1, %p978_p5 }
  0x5c   : > { %p976_p11 = pneg %p975_p6 }
  0x5d   : > { %p982_p7 = por %p981_p8, %p980_p2 }
  0x5f   : > { %p983_p9 = pnand %p982_p7, %p976_p11 }
  0x61   : > { %986 = shalt.err (!%p983_p9)
}
  0x62   : > { %s987_s8 = scalar_lea.vmem %s1347_s15, 1024  ;;  %s1122_s5 = smov [#allocation4]  }
  0x63   : > { %p988_p12 = scmp.ne.s32.totalorder %s1347_s15, %s987_s8  ;;  %s992_s14 = sshll.u32 %s1122_s5, 4  ;;  %s993_s14 = int_to_ptr.vmem [resolvable:$false] %s992_s14 }
  0x64   : > { %s994_s2 = scalar_lea.vmem %s993_s14, 2048  ;;  %p995_p3 = scmp.lt.s32.totalorder %s1347_s15, %s993_s14 }
  0x65   : > { %p990_p6 = pnand %p988_p12, %p974_p4  ;;  %p996_p5 = scmp.lt.s32.totalorder %s994_s2, %s987_s8 }
  0x67   : > { %p991_p13 = pneg %p990_p6  ;;  %p997_p1 = por %p996_p5, %p995_p3 }
  0x69   : > { %p998_p2 = pnand %p997_p1, %p991_p13 }
  0x6b   : > { %1001 = shalt.err (!%p998_p2)
}
  0x6c   : > { %s1123_s28 = smov 128   ;;  %s1124_s29 = smov 8  }
  0x6d   : > { %789 = dma.hbm_to_vmem [thread:$0]  (!%p1343_p10), %s1341_s12, 1024, %s1347_s15, %s1349_s16, %s1123_s28, %s1123_s28, %s1124_s29  }
  0x6e   : > { %p1516_p4 = scmp.ne.s32.totalorder %s1502_s27, 0 }
  0x6f   : > { %s1380_s17 = sand.u32 (!%p1516_p4), 1, %s1108_s22  }
  0x70   : > { %203 = sbr.rel (%p1516_p4) target bundleno = 405 (0x195), region = 32  ;;  %s663_s7 = sshll.u32 (!%p1516_p4), %s1380_s17, 6 }
  0x71   : > { %s206_s11 = scalar_lea.sflag (!%p1516_p4), [#allocation5], %s1380_s17  ;;  %s1384_s8 = scalar_lea.vmem (!%p1516_p4), [#allocation4], %s663_s7 }
  0x77   : > { %1071 = dma.done.wait (%p1327_p0), %s206_s11, 1024  }
  0x78   : > { %1073 = vsyncadd (%p1327_p0), %s206_s11, 4294966272  ;;  %p1517_p3 = scmp.ne.s32.totalorder %s1501_s26, 0 }
  0x7a   : > { %1075 = dma.done.wait (%p1517_p3), [#allocation8], 2048  }
  0x7b   : > { %1077 = vsyncadd (%p1517_p3), [#allocation8], 4294965248  ;;  %p1518_p13 = scmp.ne.s32.totalorder %s1506_s9, 0 }
  0x7d   : > { %1079 = dma.done.wait (%p1518_p13), [#allocation8], 16  }
  0x7e   : > { %1081 = vsyncadd (%p1518_p13), [#allocation8], 4294967280  ;;  %v884_v0 = vld [vmem:[#allocation7 + $0x40] sm:$0xff]   ;;  %v886_v2 = vld [vmem:[#allocation7 + $0x48] sm:$0xff]   ;;  %s664_s26 = sshll.u32 %s1380_s17, 5  ;;  %vm533_vm0 = vcmask 519168  }
  0x7f   : > { %v885_v1 = vld [vmem:[#allocation7] sm:$0xff]   ;;  %715 = vmatprep.subr.bf16.mxu0 %v884_v0  ;;  %755 = vmatprep.subr.bf16.mxu1 %v884_v0  ;;  %v887_v3 = vld [vmem:[#allocation7 + $0x8] sm:$0xff]   ;;  %v888_v4 = vld [vmem:[#allocation7 + $0x50] sm:$0xff]   ;;  %s1407_s27 = scalar_lea.vmem [#allocation10], %s664_s26  ;;  %s714_s9 = sshll.u32 %s1195_s24, 9 }
  0x80   : > { %716 = vmatpush3.bf16.msra.mxu0 %v885_v1  ;;  %763 = vmatpush3.bf16.msra.mxu1 %v885_v1  ;;  %v889_v5 = vld [vmem:[#allocation7 + $0x10] sm:$0xff]   ;;  %v890_v6 = vld [vmem:[#allocation7 + $0x58] sm:$0xff]   ;;  %v892_v8 = vld [vmem:[#allocation7 + $0x60] sm:$0xff]   ;;  %s556_s6 = sshll.u32 %s1407_s27, 4  ;;  %s1422_s15 = scalar_lea.hbm %s1490_s4, %s714_s9  ;;  %s1424_s6 = int_to_ptr.vmem [resolvable:$true] %s556_s6 }
  0x81   : > { %717 = vmatprep.subr.bf16.mxu0 %v886_v2  ;;  %756 = vmatprep.subr.bf16.mxu1 %v886_v2  ;;  %v891_v7 = vld [vmem:[#allocation7 + $0x18] sm:$0xff]   ;;  %v893_v9 = vld [vmem:[#allocation7 + $0x20] sm:$0xff]   ;;  %v894_v10 = vld [vmem:[#allocation7 + $0x68] sm:$0xff]   ;;  %s543_s24 = scalar_lea.sflag [#allocation6], %s1380_s17  ;;  %s1002_s16 = scalar_lea.vmem %s1424_s6, 512 }
  0x82   : > { %v902_v11 = vld [vmem:[%s1384_s8 + $0x4] ss:$8 sps:$4 sm:$0xff]   ;;  %v896_v14 = vld [vmem:[#allocation7 + $0x70] sm:$0xff]   ;;  %v898_v16 = vld [vmem:[#allocation7 + $0x78] sm:$0xff]   ;;  %p1003_p0 = scmp.ne.s32.totalorder %s1424_s6, %s1002_s16  ;;  %p1519_p10 = scmp.ne.s32.totalorder %s1511_s30, 0 }
  0x83   : > { %v905_v12 = vld [vmem:[%s1384_s8 + $0x24] ss:$8 sps:$4 sm:$0xff]   ;;  %460 = vmatprep.mubr.bf16.mxu0 %v902_v11  ;;  %v897_v15 = vld [vmem:[#allocation7 + $0x30] sm:$0xff]   ;;  %v899_v17 = vld [vmem:[#allocation7 + $0x38] sm:$0xff]   ;;  %s1125_s5 = smov [#allocation10]  }
  0x84   : > { %718 = vmatpush3.bf16.msra.mxu0 %v887_v3  ;;  %764 = vmatpush3.bf16.msra.mxu1 %v887_v3  ;;  %v895_v13 = vld [vmem:[#allocation7 + $0x28] sm:$0xff]   ;;  %v906_v20 = vld [vmem:[%s1384_s8 + $0x14] ss:$8 sps:$4 sm:$0xff]   ;;  %v910_v22 = vld [vmem:[%s1384_s8 + $0x10] ss:$8 sps:$4 sm:$0xff]   ;;  %p1004_p11 = pnand %p1003_p0, %p1519_p10  ;;  %s1006_s14 = sshll.u32 %s1125_s5, 4  ;;  %s1007_s14 = int_to_ptr.vmem [resolvable:$false] %s1006_s14 }
  0x85   : > { %719 = vmatprep.subr.bf16.mxu0 %v888_v4  ;;  %757 = vmatprep.subr.bf16.mxu1 %v888_v4  ;;  %v900_v18 = vld [vmem:[%s1384_s8] ss:$8 sps:$4 sm:$0xff]   ;;  %v908_v21 = vld [vmem:[%s1384_s8 + $0x34] ss:$8 sps:$4 sm:$0xff]   ;;  %v911_v23 = vld [vmem:[%s1384_s8 + $0x30] ss:$8 sps:$4 sm:$0xff]   ;;  %p1009_p7 = scmp.lt.s32.totalorder %s1424_s6, %s1007_s14 }
  0x86   : > { %476 = vmatprep.mubr.bf16.mxu1 %v905_v12  ;;  %v903_v19 = vld [vmem:[%s1384_s8 + $0x20] ss:$8 sps:$4 sm:$0xff]   ;;  %p1005_p8 = pneg %p1004_p11  ;;  %s1008_s2 = scalar_lea.vmem %s1007_s14, 1024 }
  0x87   : > { %v665_v26 = vld [vmem:[#allocation9] ss:$0 sm:$0xff]  ;;  %p1010_p9 = scmp.lt.s32.totalorder %s1008_s2, %s1002_s16 }
  0x88   : > { %720 = vmatpush3.bf16.msra.mxu0 %v889_v5  ;;  %765 = vmatpush3.bf16.msra.mxu1 %v889_v5 }
  0x89   : > { %721 = vmatprep.subr.bf16.mxu0 %v890_v6  ;;  %758 = vmatprep.subr.bf16.mxu1 %v890_v6  ;;  %p1011_p12 = por %p1010_p9, %p1009_p7 }
  0x8b   : > { %p1012_p6 = pnand %p1011_p12, %p1005_p8 }
  0x8c   : > { %722 = vmatpush3.bf16.msra.mxu0 %v891_v7  ;;  %766 = vmatpush3.bf16.msra.mxu1 %v891_v7 }
  0x8d   : > { %723 = vmatprep.subr.bf16.mxu0 %v892_v8  ;;  %759 = vmatprep.subr.bf16.mxu1 %v892_v8 }
  0x90   : > { %724 = vmatpush3.bf16.msra.mxu0 %v893_v9  ;;  %767 = vmatpush3.bf16.msra.mxu1 %v893_v9 }
  0x91   : > { %725 = vmatprep.subr.bf16.mxu0 %v894_v10  ;;  %760 = vmatprep.subr.bf16.mxu1 %v894_v10 }
  0x94   : > { %726 = vmatpush3.bf16.msra.mxu0 %v895_v13  ;;  %768 = vmatpush3.bf16.msra.mxu1 %v895_v13 }
  0x95   : > { %727 = vmatprep.subr.bf16.mxu0 %v896_v14  ;;  %761 = vmatprep.subr.bf16.mxu1 %v896_v14 }
  0x98   : > { %728 = vmatpush3.bf16.msra.mxu0 %v897_v15  ;;  %769 = vmatpush3.bf16.msra.mxu1 %v897_v15 }
  0x99   : > { %729 = vmatprep.subr.bf16.mxu0 %v898_v16  ;;  %762 = vmatprep.subr.bf16.mxu1 %v898_v16 }
  0x9c   : > { %730 = vmatpush3.bf16.msra.mxu0 %v899_v17  ;;  %770 = vmatpush3.bf16.msra.mxu1 %v899_v17 }
  0x9f   : > { %461 = vmatmul.mubr.bf16.vlgmr.msra.gmra.mrb[0].mxu0 %v900_v18  ;;  %477 = vmatmul.mubr.bf16.vlgmr.msra.gmra.mrb[0].mxu1 %v903_v19 }
  0xa0   : > { %468 = vmatprep.mubr.bf16.mxu0 %v906_v20  ;;  %484 = vmatprep.mubr.bf16.mxu1 %v908_v21 }
  0xa7   : > { %469 = vmatmul.mubr.bf16.gmra.mrb[4].mxu0 %v910_v22  ;;  %485 = vmatmul.mubr.bf16.gmra.mrb[4].mxu1 %v911_v23 }
 0x172   : > { %v731_v24 = vpop.f32.mrb[0].mxu0  ;;  %v743_v25 = vpop.f32.mrb[0].mxu1 }
 0x173   : > { %v732_v27 = vpop.f32.mrb[1].mxu0  ;;  %v744_v28 = vpop.f32.mrb[1].mxu1 }
 0x174   : > { %v733_v29 = vadd.f32 %v732_v27, %v731_v24  ;;  %v745_v30 = vadd.f32 %v744_v28, %v743_v25  ;;  %v734_v31 = vpop.f32.mrb[2].mxu0  ;;  %v746_v32 = vpop.f32.mrb[2].mxu1 }
 0x175   : > { %v735_v33 = vpop.f32.mrb[3].mxu0  ;;  %v747_v34 = vpop.f32.mrb[3].mxu1 }
 0x176   : > { %v463_v35 = vadd.f32 %v733_v29, %v665_v26  ;;  %v479_v36 = vadd.f32 %v745_v30, %v665_v26  ;;  %v736_v37 = vadd.f32 %v735_v33, %v734_v31  ;;  %v748_v38 = vadd.f32 %v747_v34, %v746_v32 }
 0x178   : > { %v493_v39 = vmax.f32 %v463_v35, 0.0  ;;  %v497_v40 = vmax.f32 %v479_v36, 0.0  ;;  %v466_v41 = vadd.f32 %v736_v37, %v665_v26  ;;  %v482_v42 = vadd.f32 %v748_v38, %v665_v26 }
 0x17a   : > { %v706_v43 = vpack.c.bf16 %v493_v39, %v493_v39  ;;  %v710_v44 = vpack.c.bf16 %v497_v40, %v497_v40  ;;  %v494_v45 = vmax.f32 %v466_v41, 0.0  ;;  %v498_v46 = vmax.f32 %v482_v42, 0.0  ;;  %v737_v47 = vpop.f32.mrb[4].mxu0  ;;  %v749_v48 = vpop.f32.mrb[4].mxu1 }
 0x17b   : > { %v738_v49 = vpop.f32.mrb[5].mxu0  ;;  %v750_v50 = vpop.f32.mrb[5].mxu1 }
 0x17c   : > { %534 = vst.msk [vmem:[%s1407_s27] sm:$0xf] %vm533_vm0, %v706_v43  ;;  %538 = vst.msk [vmem:[%s1407_s27 + $0x10] sm:$0xf] %vm533_vm0, %v710_v44  ;;  %v707_v51 = vpack.c.bf16 %v494_v45, %v494_v45  ;;  %v711_v52 = vpack.c.bf16 %v498_v46, %v498_v46  ;;  %v739_v53 = vadd.f32 %v738_v49, %v737_v47  ;;  %v740_v55 = vpop.f32.mrb[6].mxu0  ;;  %v752_v56 = vpop.f32.mrb[6].mxu1 }
 0x17d   : > { %v751_v54 = vadd.f32 %v750_v50, %v749_v48  ;;  %v741_v57 = vpop.f32.mrb[7].mxu0  ;;  %v753_v58 = vpop.f32.mrb[7].mxu1 }
 0x17e   : > { %535 = vst.msk [vmem:[%s1407_s27 + $0x4] sm:$0xf] %vm533_vm0, %v707_v51  ;;  %539 = vst.msk [vmem:[%s1407_s27 + $0x14] sm:$0xf] %vm533_vm0, %v711_v52  ;;  %v471_v59 = vadd.f32 %v739_v53, %v665_v26  ;;  %v742_v61 = vadd.f32 %v741_v57, %v740_v55  ;;  %v754_v62 = vadd.f32 %v753_v58, %v752_v56 }
 0x17f   : > { %v487_v60 = vadd.f32 %v751_v54, %v665_v26 }
 0x180   : > { %v495_v63 = vmax.f32 %v471_v59, 0.0  ;;  %v474_v1 = vadd.f32 %v742_v61, %v665_v26  ;;  %v490_v2 = vadd.f32 %v754_v62, %v665_v26 }
 0x181   : > { %v499_v0 = vmax.f32 %v487_v60, 0.0 }
 0x182   : > { %v708_v3 = vpack.c.bf16 %v495_v63, %v495_v63  ;;  %v496_v5 = vmax.f32 %v474_v1, 0.0  ;;  %v500_v6 = vmax.f32 %v490_v2, 0.0 }
 0x183   : > { %v712_v4 = vpack.c.bf16 %v499_v0, %v499_v0 }
 0x184   : > { %536 = vst.msk [vmem:[%s1407_s27 + $0x8] sm:$0xf] %vm533_vm0, %v708_v3  ;;  %v709_v7 = vpack.c.bf16 %v496_v5, %v496_v5  ;;  %v713_v8 = vpack.c.bf16 %v500_v6, %v500_v6 }
 0x185   : > { %540 = vst.msk [vmem:[%s1407_s27 + $0x18] sm:$0xf] %vm533_vm0, %v712_v4 }
 0x186   : > { %537 = vst.msk [vmem:[%s1407_s27 + $0xc] sm:$0xf] %vm533_vm0, %v709_v7  ;;  %541 = vst.msk [vmem:[%s1407_s27 + $0x1c] sm:$0xf] %vm533_vm0, %v713_v8 }
 0x187   : > { %1015 = shalt.err (!%p1012_p6)
}
 0x188   : > { %s1016_s28 = scalar_lea.hbm %s1422_s15, 512  ;;  %s1020_s11 = scalar_lea.hbm %s1490_s4, 1024 }
 0x189   : > { %p1017_p5 = scmp.ne.s32.totalorder %s1422_s15, %s1016_s28  ;;  %p1021_p4 = scmp.lt.u32.totalorder %s1422_s15, %s1490_s4 }
 0x18a   : > { %p1022_p3 = scmp.lt.u32.totalorder %s1020_s11, %s1016_s28  ;;  %p1024_p0 = scmp.lt.u32.totalorder %s1016_s28, %s1422_s15 }
 0x18b   : > { %p1018_p1 = pnand %p1017_p5, %p1519_p10 }
 0x18c   : > { %p1023_p13 = por %p1022_p3, %p1021_p4 }
 0x18d   : > { %p1019_p2 = pneg %p1018_p1 }
 0x18e   : > { %p1025_p11 = por %p1024_p0, %p1023_p13 }
 0x190   : > { %p1026_p8 = pnand %p1025_p11, %p1019_p2 }
 0x192   : > { %1029 = shalt.err (!%p1026_p8)
}
 0x193   : > { %s1126_s27 = smov 64   ;;  %s1127_s9 = smov 4  }
 0x194   : > { %777 = dma.vmem_to_hbm [thread:$0]  (%p1519_p10), %s1424_s6, 512, %s1422_s15, %s543_s24, %s1126_s27, %s1126_s27, %s1127_s9  }
 0x195 PF: > { %s571_s12 = sand.u32 1, %s1104_s21   ;;  %p1520_p7 = scmp.ne.s32.totalorder %s1514_s25, 0 }
 0x196   : > { %p1521_p9 = scmp.ge.s32.totalorder %s1116_s0, 2  ;;  %s572_s13 = scalar_lea.sflag [#allocation6], %s571_s12 }
 0x198   : > { %p791_p12 = pnand %p1521_p9, %p1520_p7 }
 0x19a   : > { %1083 = dma.done.wait (!%p791_p12), %s572_s13, 512  }
 0x19b   : > { %1085 = vsyncadd (!%p791_p12), %s572_s13, 4294966784  ;;  %s1522_s30 = smov %s1306_s19  ;;  %p19_p6 = scmp.ge.s32.totalorder %s1306_s19, 4  }
 0x19c   : > { %s1523_s17 = smov %s1092_s18  ;;  %s1467_s18 = smov 0  }
 0x19d   : > { %s1524_s19 = smov %s1100_s20  ;;  %s1472_s20 = smov 0  }
 0x19e   : > { %s1525_s21 = smov %s1108_s22  ;;  %s1526_s22 = smov %s1112_s23 }
 0x19f   : > { %s1527_s23 = smov %s1323_s10  ;;  %s1528_s0 = smov %s1522_s30 }
 0x1a0   :  { %21 = sbr.rel (!%p19_p6) target bundleno = 11 (0xb), region = 87 }
 0x1a7   :  { %577 = vsyncpa [#allocation5], 1 }
 0x1a8   :  { %579 = vsyncpa [#allocation5 + $0x1], 1 }
 0x1a9   :  { %580 = vsyncpa [#allocation8], 1 }
 0x1aa   :  { %581 = vsyncpa [#allocation6], 1 }
 0x1ab   :  { %583 = vsyncpa [#allocation6 + $0x1], 1 }

// kernel: forward.4
= control target key start
LH: loop header
LB: loop body
LE: loop exit
PB: predicated region body
PF: predicated region fallthrough
CT: control target
= control target key end

     0   :  { %s2022_s0 = inlined_call_operand.<no memory space> [shape: s32[1], index: 0, kind: input, shape index: {}]   ;;  %s2023_s1 = inlined_call_operand.hbm [shape: bf16[32,1024], index: 1, kind: input, shape index: {}]   ;;  %s2024_s2 = inlined_call_operand.hbm [shape: bf16[6,1024,128], index: 2, kind: input, shape index: {}]   ;;  %s2025_s3 = inlined_call_operand.hbm [shape: f32[6,1,128], index: 3, kind: input, shape index: {}]   ;;  %s2026_s4 = inlined_call_operand.hbm [shape: bf16[32,128], index: 4, kind: output, shape index: {}]  }
   0x1   :  { %2036 = sst [smem:[#allocation15_spill]] %s2024_s2 }
   0x2   :  { %9 = sst [smem:[#allocation3]] %s2022_s0 }
   0x3   :  { %10 = vsyncpa [#allocation5], 0 }
   0x4   :  { %12 = vsyncpa [#allocation5 + $0x1], 0 }
   0x5   :  { %13 = vsyncpa [#allocation8], 0 }
   0x6   :  { %14 = vsyncpa [#allocation6], 0 }
   0x7   :  { %16 = vsyncpa [#allocation6 + $0x1], 0  ;;  %s1711_s17 = smov 0   ;;  %s1713_s18 = smov 0  }
   0x8   :  { %s1715_s19 = smov 0   ;;  %s1717_s20 = smov 0  }
   0x9   :  { %s1719_s21 = smov 0   ;;  %s1721_s22 = smov 0  }
   0xa   :  { %s1723_s23 = smov 0   ;;  %s1725_s0 = smov 0  }
   0xb LB: > { %s1750_s24 = sadd.s32 4294967295, %s1671_s0   ;;  %s1752_s25 = sld [smem:[#allocation3]]  ;;  %s1671_s0 = sphi %s1725_s0, %s2064_s0   ;;  %s1667_s23 = sphi %s1723_s23, %s2063_s23   ;;  %s1663_s22 = sphi %s1721_s22, %s2062_s22   ;;  %s1659_s21 = sphi %s1719_s21, %s2061_s21   ;;  %s1655_s20 = sphi %s1717_s20, %s2008_s20   ;;  %s1651_s19 = sphi %s1715_s19, %s2060_s19   ;;  %s1647_s18 = sphi %s1713_s18, %s2003_s18   ;;  %s1643_s17 = sphi %s1711_s17, %s2059_s17  }
   0xc   : > { %p2028_p0 = scmp.eq.s32.totalorder %s1750_s24, 0  ;;  %p70_p1 = scmp.ne.s32.totalorder %s1655_s20, %s1651_s19 }
   0xd   : > { %p1099_p3 = scmp.ge.s32.totalorder %s1671_s0, 1  ;;  %p135_p5 = scmp.lt.s32.totalorder %s1671_s0, 3 }
   0xe   : > { %p1760_p4 = por %p70_p1, %p2028_p0  ;;  %s2039_s2 = sld [smem:[#allocation15_spill]] }
   0xf   : > { %p1765_p6 = pnand %p1099_p3, %p135_p5  ;;  %s1673_s6 = smov [#allocation7]  }
  0x10   : > { %s2037_s26 = scalar_select %p1760_p4, 1, 0 }
  0x11   : > { %s2038_s27 = scalar_select %p1765_p6, 1, 0 }
  0x12   : > { %s1191_s28 = sshll.u32 %s1752_s25, 13  ;;  %p2027_p7 = pneg %p1765_p6 }
  0x13   : > { %s151_s7 = sshll.u32 %s1673_s6, 4  ;;  %s1786_s7 = int_to_ptr.vmem [resolvable:$true] %s151_s7 }
  0x14   : > { %s1775_s5 = scalar_lea.hbm %s2039_s2, %s1191_s28  ;;  %p1782_p8 = pnand %p2027_p7, %p1760_p4 }
  0x15   : > { %s1467_s9 = scalar_lea.hbm %s1775_s5, 8192  ;;  %s1472_s12 = scalar_lea.hbm %s2039_s2, 49152 }
  0x16   : > { %p1468_p10 = scmp.ne.s32.totalorder %s1775_s5, %s1467_s9  ;;  %p1469_p11 = pneg %p1782_p8 }
  0x17   : > { %p1473_p1 = scmp.lt.u32.totalorder %s1775_s5, %s2039_s2  ;;  %p1474_p3 = scmp.lt.u32.totalorder %s1472_s12, %s1467_s9 }
  0x18   : > { %p1470_p12 = pnand %p1469_p11, %p1468_p10  ;;  %p1476_p2 = scmp.lt.u32.totalorder %s1467_s9, %s1775_s5 }
  0x19   : > { %p1475_p5 = por %p1474_p3, %p1473_p1 }
  0x1a   : > { %p1471_p13 = pneg %p1470_p12 }
  0x1b   : > { %p1477_p9 = por %p1476_p2, %p1475_p5 }
  0x1d   : > { %p1478_p7 = pnand %p1477_p9, %p1471_p13 }
  0x1f   : > { %1481 = shalt.err (!%p1478_p7)
}
  0x20   : > { %s1482_s15 = scalar_lea.vmem %s1786_s7, 8192  ;;  %p1490_p4 = scmp.lt.s32.totalorder %s1786_s7, %s1786_s7 }
  0x21   : > { %p1483_p10 = scmp.ne.s32.totalorder %s1786_s7, %s1482_s15  ;;  %p1491_p6 = scmp.lt.s32.totalorder %s1482_s15, %s1482_s15 }
  0x23   : > { %p1485_p12 = pnand %p1483_p10, %p1469_p11  ;;  %p1492_p1 = por %p1491_p6, %p1490_p4 }
  0x25   : > { %p1486_p0 = pneg %p1485_p12 }
  0x27   : > { %p1493_p3 = pnand %p1492_p1, %p1486_p0 }
  0x29   : > { %1496 = shalt.err (!%p1493_p3)
}
  0x2a   : > { %s1674_s16 = smov 64   ;;  %s1675_s19 = smov 4  }
  0x2b   : > { %1301 = dma.hbm_to_vmem [thread:$0]  (!%p1782_p8), %s1775_s5, 8192, %s1786_s7, [#allocation8], %s1674_s16, %s1674_s16, %s1675_s19  }
  0x2c   : > { %p98_p2 = scmp.ne.s32.totalorder %s1647_s18, %s1643_s17  ;;  %s1102_s28 = sshll.u32 %s1752_s25, 4 }
  0x2d   : > { %s1821_s6 = scalar_lea.hbm %s2025_s3, %s1102_s28  ;;  %p2041_p0 = scmp.eq.s32.totalorder %s1750_s24, 0 }
  0x2e   : > { %s1676_s10 = smov [#allocation9]   ;;  %p2043_p6 = scmp.ne.s32.totalorder %s2038_s27, 0 }
  0x2f   : > { %p1825_p4 = por %p98_p2, %p2041_p0  ;;  %s168_s8 = sshll.u32 %s1676_s10, 4  ;;  %s169_s8 = int_to_ptr.vmem [resolvable:$true] %s168_s8 }
  0x30   : > { %p2044_p7 = pneg %p2043_p6  ;;  %s1497_s25 = scalar_lea.hbm %s1821_s6, 16 }
  0x31   : > { %s2042_s9 = scalar_select %p1825_p4, 1, 0 }
  0x32   : > { %p1834_p8 = pnand %p2044_p7, %p1825_p4  ;;  %p1498_p9 = scmp.ne.s32.totalorder %s1821_s6, %s1497_s25 }
  0x33   : > { %s1502_s11 = scalar_lea.hbm %s2025_s3, 96  ;;  %p1503_p10 = scmp.lt.u32.totalorder %s1821_s6, %s2025_s3 }
  0x34   : > { %p1499_p11 = pneg %p1834_p8  ;;  %p1504_p12 = scmp.lt.u32.totalorder %s1502_s11, %s1497_s25 }
  0x35   : > { %p1506_p3 = scmp.lt.u32.totalorder %s1497_s25, %s1821_s6 }
  0x36   : > { %p1500_p13 = pnand %p1499_p11, %p1498_p9  ;;  %p1505_p1 = por %p1504_p12, %p1503_p10 }
  0x38   : > { %p1501_p5 = pneg %p1500_p13  ;;  %p1507_p2 = por %p1506_p3, %p1505_p1 }
  0x3a   : > { %p1508_p0 = pnand %p1507_p2, %p1501_p5 }
  0x3c   : > { %1511 = shalt.err (!%p1508_p0)
}
  0x3d   : > { %s1512_s14 = scalar_lea.vmem %s169_s8, 16  ;;  %s1519_s15 = scalar_lea.vmem %s169_s8, 32 }
  0x3e   : > { %p1513_p7 = scmp.ne.s32.totalorder %s169_s8, %s1512_s14  ;;  %p1520_p4 = scmp.lt.s32.totalorder %s169_s8, %s169_s8 }
  0x3f   : > { %p1521_p6 = scmp.lt.s32.totalorder %s1519_s15, %s1512_s14 }
  0x40   : > { %p1515_p9 = pnand %p1513_p7, %p1499_p11 }
  0x41   : > { %p1522_p10 = por %p1521_p6, %p1520_p4 }
  0x42   : > { %p1516_p13 = pneg %p1515_p9 }
  0x44   : > { %p1523_p12 = pnand %p1522_p10, %p1516_p13 }
  0x46   : > { %1526 = shalt.err (!%p1523_p12)
}
  0x47   : > { %1304 = dma.hbm_to_vmem [thread:$0]  (!%p1834_p8), %s1821_s6, 16, %s169_s8, [#allocation8]  }
  0x48   : > { %s1098_s16 = sadd.s32 4294967294, %s1671_s0   ;;  %s1861_s19 = sadd.s32 1, %s1671_s0  }
  0x49   : > { %s29_s28 = sadd.s32 1, %s1667_s23  ;;  %s26_s29 = ssub.s32 %s1671_s0, %s1861_s19 }
  0x4a   : > { %p36_p4 = scmp.ne.s32.totalorder %s1667_s23, %s1663_s22  ;;  %p27_p6 = scmp.eq.s32.totalorder %s26_s29, 0 }
  0x4b   : > { %p37_p11 = scmp.eq.s32.totalorder %s1671_s0, 0  ;;  %p42_p5 = scmp.ne.s32.totalorder %s1663_s22, %s1659_s21 }
  0x4c   : > { %p2046_p1 = scmp.eq.s32.totalorder %s1750_s24, 1  ;;  %p2048_p8 = scmp.eq.s32.totalorder %s1750_s24, 0 }
  0x4d   : > { %s1878_s10 = scalar_select %p27_p6, %s1667_s23, %s29_s28  }
  0x4e   : > { %p1873_p3 = por %p2046_p1, %p36_p4  ;;  %p38_p2 = por %p37_p11, %p36_p4 }
  0x4f   : > { %p1882_p0 = por %p2048_p8, %p42_p5  ;;  %p128_p7 = scmp.eq.s32.totalorder %s1098_s16, 1 }
  0x50   : > { %s2047_s30 = scalar_select %p1873_p3, 1, 0 }
  0x51   : > { %p1313_p9 = scmp.lt.s32.totalorder %s1671_s0, 2  ;;  %s179_s8 = sand.u32 1, %s1667_s23  }
  0x52   : > { %s1193_s17 = sshll.u32 %s1671_s0, 10  ;;  %p1889_p13 = por %p128_p7, %p42_p5 }
  0x53   : > { %s1104_s5 = sshll.u32 %s179_s8, 6  ;;  %s1896_s12 = scalar_lea.hbm %s2023_s1, %s1193_s17 }
  0x54   : > { %s2050_s25 = scalar_select %p1889_p13, 1, 0 }
  0x55   : > { %p1898_p10 = pnand %p1313_p9, %p38_p2  ;;  %s183_s14 = scalar_lea.vmem [#allocation4], %s1104_s5 }
  0x56   : > { %s191_s15 = sshll.u32 %s183_s14, 4  ;;  %s1904_s16 = scalar_lea.sflag [#allocation5], %s179_s8  ;;  %s1902_s15 = int_to_ptr.vmem [resolvable:$true] %s191_s15 }
  0x57   : > { %s1527_s28 = scalar_lea.hbm %s1896_s12, 1024  ;;  %p1529_p4 = pneg %p1898_p10 }
  0x58   : > { %p1528_p12 = scmp.ne.s32.totalorder %s1896_s12, %s1527_s28  ;;  %s1532_s7 = scalar_lea.hbm %s2023_s1, 2048 }
  0x59   : > { %p1533_p5 = scmp.lt.u32.totalorder %s1896_s12, %s2023_s1  ;;  %p1534_p1 = scmp.lt.u32.totalorder %s1532_s7, %s1527_s28 }
  0x5a   : > { %p1530_p6 = pnand %p1529_p4, %p1528_p12  ;;  %p1536_p8 = scmp.lt.u32.totalorder %s1527_s28, %s1896_s12 }
  0x5b   : > { %p1535_p2 = por %p1534_p1, %p1533_p5 }
  0x5c   : > { %p1531_p11 = pneg %p1530_p6 }
  0x5d   : > { %p1537_p7 = por %p1536_p8, %p1535_p2 }
  0x5f   : > { %p1538_p9 = pnand %p1537_p7, %p1531_p11 }
  0x61   : > { %1541 = shalt.err (!%p1538_p9)
}
  0x62   : > { %s1542_s8 = scalar_lea.vmem %s1902_s15, 1024  ;;  %s1677_s5 = smov [#allocation4]  }
  0x63   : > { %p1543_p12 = scmp.ne.s32.totalorder %s1902_s15, %s1542_s8  ;;  %s1547_s14 = sshll.u32 %s1677_s5, 4  ;;  %s1548_s14 = int_to_ptr.vmem [resolvable:$false] %s1547_s14 }
  0x64   : > { %s1549_s2 = scalar_lea.vmem %s1548_s14, 2048  ;;  %p1550_p3 = scmp.lt.s32.totalorder %s1902_s15, %s1548_s14 }
  0x65   : > { %p1545_p6 = pnand %p1543_p12, %p1529_p4  ;;  %p1551_p5 = scmp.lt.s32.totalorder %s1549_s2, %s1542_s8 }
  0x67   : > { %p1546_p13 = pneg %p1545_p6  ;;  %p1552_p1 = por %p1551_p5, %p1550_p3 }
  0x69   : > { %p1553_p2 = pnand %p1552_p1, %p1546_p13 }
  0x6b   : > { %1556 = shalt.err (!%p1553_p2)
}
  0x6c   : > { %s1678_s28 = smov 512   ;;  %s1679_s29 = smov 32  }
  0x6d   : > { %1308 = dma.hbm_to_vmem [thread:$0]  (!%p1898_p10), %s1896_s12, 1024, %s1902_s15, %s1904_s16, %s1678_s28, %s1678_s28, %s1679_s29  }
  0x6e   : > { %p2052_p4 = scmp.ne.s32.totalorder %s2038_s27, 0 }
  0x6f   : > { %s1935_s17 = sand.u32 (!%p2052_p4), 1, %s1663_s22  }
  0x70   : > { %203 = sbr.rel (%p2052_p4) target bundleno = 432 (0x1b0), region = 32  ;;  %s1109_s7 = sshll.u32 (!%p2052_p4), %s1935_s17, 6 }
  0x71   : > { %s206_s11 = scalar_lea.sflag (!%p2052_p4), [#allocation5], %s1935_s17  ;;  %s1939_s8 = scalar_lea.vmem (!%p2052_p4), [#allocation4], %s1109_s7 }
  0x77   : > { %1626 = dma.done.wait (%p1882_p0), %s206_s11, 1024  }
  0x78   : > { %1628 = vsyncadd (%p1882_p0), %s206_s11, 4294966272  ;;  %p2053_p3 = scmp.ne.s32.totalorder %s2037_s26, 0 }
  0x7a   : > { %1630 = dma.done.wait (%p2053_p3), [#allocation8], 8192  }
  0x7b   : > { %1632 = vsyncadd (%p2053_p3), [#allocation8], 4294959104  ;;  %p2054_p13 = scmp.ne.s32.totalorder %s2042_s9, 0 }
  0x7d   : > { %1634 = dma.done.wait (%p2054_p13), [#allocation8], 16  }
  0x7e   : > { %1636 = vsyncadd (%p2054_p13), [#allocation8], 4294967280  ;;  %v1403_v0 = vld [vmem:[#allocation7 + $0x40] sm:$0xff]   ;;  %v1407_v4 = vld [vmem:[#allocation7 + $0x48] sm:$0xff]   ;;  %s1110_s26 = sshll.u32 %s1935_s17, 3  ;;  %s1196_s27 = sshll.u32 %s1750_s24, 7 }
  0x7f   : > { %v1404_v1 = vld [vmem:[#allocation7 + $0xc0] sm:$0xff]   ;;  %1202 = vmatprep.subr.bf16.mxu0 %v1403_v0  ;;  %v1408_v5 = vld [vmem:[#allocation7 + $0xc8] sm:$0xff]   ;;  %v1411_v8 = vld [vmem:[#allocation7 + $0x50] sm:$0xff]   ;;  %s239_s9 = scalar_lea.vmem [#allocation10], %s1110_s26  ;;  %s1966_s15 = scalar_lea.hbm %s2026_s4, %s1196_s27 }
  0x80   : > { %v1405_v2 = vld [vmem:[#allocation7] sm:$0xff]   ;;  %1224 = vmatprep.subr.bf16.mxu1 %v1404_v1  ;;  %v1409_v6 = vld [vmem:[#allocation7 + $0x8] sm:$0xff]   ;;  %v1412_v9 = vld [vmem:[#allocation7 + $0xd0] sm:$0xff]   ;;  %s1002_s6 = sshll.u32 %s239_s9, 4  ;;  %s989_s16 = scalar_lea.sflag [#allocation6], %s1935_s17  ;;  %s1968_s6 = int_to_ptr.vmem [resolvable:$true] %s1002_s6 }
  0x81   : > { %v1406_v3 = vld [vmem:[#allocation7 + $0x80] sm:$0xff]   ;;  %1203 = vmatpush3.bf16.msra.mxu0 %v1405_v2  ;;  %v1410_v7 = vld [vmem:[#allocation7 + $0x88] sm:$0xff]   ;;  %v1413_v10 = vld [vmem:[#allocation7 + $0x10] sm:$0xff]   ;;  %s1557_s5 = scalar_lea.vmem %s1968_s6, 128  ;;  %p2055_p10 = scmp.ne.s32.totalorder %s2047_s30, 0 }
  0x82   : > { %1225 = vmatpush3.bf16.msra.mxu1 %v1406_v3  ;;  %1204 = vmatprep.subr.bf16.mxu0 %v1407_v4  ;;  %v1414_v11 = vld [vmem:[#allocation7 + $0x90] sm:$0xff]   ;;  %v1415_v12 = vld [vmem:[#allocation7 + $0x58] sm:$0xff]   ;;  %v1419_v16 = vld [vmem:[#allocation7 + $0x60] sm:$0xff]   ;;  %p1558_p0 = scmp.ne.s32.totalorder %s1968_s6, %s1557_s5  ;;  %s1680_s24 = smov [#allocation10]  }
  0x83   : > { %1226 = vmatprep.subr.bf16.mxu1 %v1408_v5  ;;  %v1416_v13 = vld [vmem:[#allocation7 + $0xd8] sm:$0xff]   ;;  %v1420_v17 = vld [vmem:[#allocation7 + $0xe0] sm:$0xff]   ;;  %v1423_v20 = vld [vmem:[#allocation7 + $0x68] sm:$0xff]   ;;  %s1561_s14 = sshll.u32 %s1680_s24, 4  ;;  %s1562_s14 = int_to_ptr.vmem [resolvable:$false] %s1561_s14 }
  0x84   : > { %v1417_v14 = vld [vmem:[#allocation7 + $0x18] sm:$0xff]   ;;  %v1421_v18 = vld [vmem:[#allocation7 + $0x20] sm:$0xff]   ;;  %v1424_v21 = vld [vmem:[#allocation7 + $0xe8] sm:$0xff]   ;;  %p1559_p11 = pnand %p1558_p0, %p2055_p10  ;;  %s1563_s2 = scalar_lea.vmem %s1562_s14, 256 }
  0x85   : > { %1205 = vmatpush3.bf16.msra.mxu0 %v1409_v6  ;;  %v1418_v15 = vld [vmem:[#allocation7 + $0x98] sm:$0xff]   ;;  %v1422_v19 = vld [vmem:[#allocation7 + $0xa0] sm:$0xff]   ;;  %v1425_v22 = vld [vmem:[#allocation7 + $0x28] sm:$0xff]   ;;  %p1564_p7 = scmp.lt.s32.totalorder %s1968_s6, %s1562_s14  ;;  %p1565_p9 = scmp.lt.s32.totalorder %s1563_s2, %s1557_s5 }
  0x86   : > { %1227 = vmatpush3.bf16.msra.mxu1 %v1410_v7  ;;  %1206 = vmatprep.subr.bf16.mxu0 %v1411_v8  ;;  %v1426_v23 = vld [vmem:[#allocation7 + $0xa8] sm:$0xff]   ;;  %v1427_v24 = vld [vmem:[#allocation7 + $0x70] sm:$0xff]   ;;  %v1431_v28 = vld [vmem:[#allocation7 + $0x78] sm:$0xff]   ;;  %p1560_p8 = pneg %p1559_p11 }
  0x87   : > { %1228 = vmatprep.subr.bf16.mxu1 %v1412_v9  ;;  %v1428_v25 = vld [vmem:[#allocation7 + $0xf0] sm:$0xff]   ;;  %v1432_v29 = vld [vmem:[#allocation7 + $0xf8] sm:$0xff]   ;;  %v245_v32 = vld [vmem:[%s1939_s8] sm:$0xff]  ;;  %p1566_p12 = por %p1565_p9, %p1564_p7 }
  0x88   : > { %v1429_v26 = vld [vmem:[#allocation7 + $0x30] sm:$0xff]   ;;  %v1433_v30 = vld [vmem:[#allocation7 + $0x38] sm:$0xff]   ;;  %v249_v33 = vld [vmem:[%s1939_s8 + $0x20] sm:$0xff] }
  0x89   : > { %1207 = vmatpush3.bf16.msra.mxu0 %v1413_v10  ;;  %v1430_v27 = vld [vmem:[#allocation7 + $0xb0] sm:$0xff]   ;;  %v1434_v31 = vld [vmem:[#allocation7 + $0xb8] sm:$0xff]   ;;  %v246_v34 = vld [vmem:[%s1939_s8 + $0x8] sm:$0xff]  ;;  %v1112_v35 = vcombine.low %v245_v32, %v249_v33  ;;  %v1113_v36 = vcombine.high %v245_v32, %v249_v33  ;;  %p1567_p6 = pnand %p1566_p12, %p1560_p8 }
  0x8a   : > { %1229 = vmatpush3.bf16.msra.mxu1 %v1414_v11  ;;  %1208 = vmatprep.subr.bf16.mxu0 %v1415_v12  ;;  %v250_v37 = vld [vmem:[%s1939_s8 + $0x28] sm:$0xff]  ;;  %v1435_v40 = vld [vmem:[#allocation7 + $0x140] sm:$0xff]   ;;  %v1443_v48 = vld [vmem:[#allocation7 + $0x150] sm:$0xff]  }
  0x8b   : > { %1230 = vmatprep.subr.bf16.mxu1 %v1416_v13  ;;  %v1114_v38 = vcombine.low %v246_v34, %v250_v37  ;;  %v1115_v39 = vcombine.high %v246_v34, %v250_v37  ;;  %844 = vmatprep.mubr.bf16.mxu0 %v1113_v36  ;;  %v1436_v41 = vld [vmem:[#allocation7 + $0x1c0] sm:$0xff]   ;;  %v1439_v44 = vld [vmem:[#allocation7 + $0x148] sm:$0xff]   ;;  %v1444_v49 = vld [vmem:[#allocation7 + $0x1d0] sm:$0xff]  }
  0x8c   : > { %v1437_v42 = vld [vmem:[#allocation7 + $0x100] sm:$0xff]   ;;  %v1440_v45 = vld [vmem:[#allocation7 + $0x1c8] sm:$0xff]   ;;  %v1445_v50 = vld [vmem:[#allocation7 + $0x110] sm:$0xff]  }
  0x8d   : > { %1209 = vmatpush3.bf16.msra.mxu0 %v1417_v14  ;;  %885 = vmatprep.mubr.bf16.mxu1 %v1115_v39  ;;  %v1438_v43 = vld [vmem:[#allocation7 + $0x180] sm:$0xff]   ;;  %v1441_v46 = vld [vmem:[#allocation7 + $0x108] sm:$0xff]   ;;  %v1446_v51 = vld [vmem:[#allocation7 + $0x190] sm:$0xff]  }
  0x8e   : > { %1231 = vmatpush3.bf16.msra.mxu1 %v1418_v15  ;;  %1210 = vmatprep.subr.bf16.mxu0 %v1419_v16  ;;  %v1442_v47 = vld [vmem:[#allocation7 + $0x188] sm:$0xff]   ;;  %v1447_v52 = vld [vmem:[#allocation7 + $0x158] sm:$0xff]   ;;  %v1451_v56 = vld [vmem:[#allocation7 + $0x160] sm:$0xff]  }
  0x8f   : > { %1232 = vmatprep.subr.bf16.mxu1 %v1420_v17  ;;  %v1448_v53 = vld [vmem:[#allocation7 + $0x1d8] sm:$0xff]   ;;  %v1452_v57 = vld [vmem:[#allocation7 + $0x1e0] sm:$0xff]   ;;  %v1455_v60 = vld [vmem:[#allocation7 + $0x168] sm:$0xff]  }
  0x90   : > { %v1449_v54 = vld [vmem:[#allocation7 + $0x118] sm:$0xff]   ;;  %v1453_v58 = vld [vmem:[#allocation7 + $0x120] sm:$0xff]   ;;  %v1456_v61 = vld [vmem:[#allocation7 + $0x1e8] sm:$0xff]  }
  0x91   : > { %1211 = vmatpush3.bf16.msra.mxu0 %v1421_v18  ;;  %v1450_v55 = vld [vmem:[#allocation7 + $0x198] sm:$0xff]   ;;  %v1454_v59 = vld [vmem:[#allocation7 + $0x1a0] sm:$0xff]   ;;  %v1457_v62 = vld [vmem:[#allocation7 + $0x128] sm:$0xff]  }
  0x92   : > { %1233 = vmatpush3.bf16.msra.mxu1 %v1422_v19  ;;  %1212 = vmatprep.subr.bf16.mxu0 %v1423_v20  ;;  %v1458_v63 = vld [vmem:[#allocation7 + $0x1a8] sm:$0xff]   ;;  %v1459_v0 = vld [vmem:[#allocation7 + $0x170] sm:$0xff]   ;;  %v1463_v4 = vld [vmem:[#allocation7 + $0x178] sm:$0xff]  }
  0x93   : > { %1234 = vmatprep.subr.bf16.mxu1 %v1424_v21  ;;  %v1460_v1 = vld [vmem:[#allocation7 + $0x1f0] sm:$0xff]   ;;  %v1464_v5 = vld [vmem:[#allocation7 + $0x1f8] sm:$0xff]   ;;  %v1111_v18 = vld [vmem:[#allocation9] ss:$0 sm:$0xff] }
  0x94   : > { %v1461_v2 = vld [vmem:[#allocation7 + $0x130] sm:$0xff]   ;;  %v1465_v6 = vld [vmem:[#allocation7 + $0x138] sm:$0xff]  }
  0x95   : > { %1213 = vmatpush3.bf16.msra.mxu0 %v1425_v22  ;;  %v1462_v3 = vld [vmem:[#allocation7 + $0x1b0] sm:$0xff]   ;;  %v1466_v7 = vld [vmem:[#allocation7 + $0x1b8] sm:$0xff]  }
  0x96   : > { %1235 = vmatpush3.bf16.msra.mxu1 %v1426_v23  ;;  %1214 = vmatprep.subr.bf16.mxu0 %v1427_v24  ;;  %v247_v8 = vld [vmem:[%s1939_s8 + $0x10] sm:$0xff]  ;;  %v248_v12 = vld [vmem:[%s1939_s8 + $0x18] sm:$0xff] }
  0x97   : > { %1236 = vmatprep.subr.bf16.mxu1 %v1428_v25  ;;  %v251_v9 = vld [vmem:[%s1939_s8 + $0x30] sm:$0xff]  ;;  %v252_v13 = vld [vmem:[%s1939_s8 + $0x38] sm:$0xff] }
  0x98   : > { %v1116_v10 = vcombine.low %v247_v8, %v251_v9  ;;  %v1117_v11 = vcombine.high %v247_v8, %v251_v9  ;;  %v1118_v14 = vcombine.low %v248_v12, %v252_v13  ;;  %v1119_v15 = vcombine.high %v248_v12, %v252_v13 }
  0x99   : > { %1215 = vmatpush3.bf16.msra.mxu0 %v1429_v26 }
  0x9a   : > { %1237 = vmatpush3.bf16.msra.mxu1 %v1430_v27  ;;  %1216 = vmatprep.subr.bf16.mxu0 %v1431_v28 }
  0x9b   : > { %1238 = vmatprep.subr.bf16.mxu1 %v1432_v29 }
  0x9d   : > { %1217 = vmatpush3.bf16.msra.mxu0 %v1433_v30 }
  0x9e   : > { %1239 = vmatpush3.bf16.msra.mxu1 %v1434_v31  ;;  %1246 = vmatprep.subr.bf16.mxu0 %v1435_v40 }
  0x9f   : > { %1268 = vmatprep.subr.bf16.mxu1 %v1436_v41 }
  0xa0   : > { %845 = vmatmul.mubr.bf16.vlgmr.msra.gmra.mrb[0].mxu0 %v1112_v35 }
  0xa1   : > { %886 = vmatmul.mubr.bf16.vlgmr.msra.gmra.mrb[0].mxu1 %v1114_v38  ;;  %1247 = vmatpush3.bf16.msra.mxu0 %v1437_v42 }
  0xa2   : > { %1269 = vmatpush3.bf16.msra.mxu1 %v1438_v43  ;;  %1248 = vmatprep.subr.bf16.mxu0 %v1439_v44 }
  0xa3   : > { %1270 = vmatprep.subr.bf16.mxu1 %v1440_v45  ;;  %926 = vmatprep.mubr.bf16.mxu0 %v1117_v11 }
  0xa4   : > { %967 = vmatprep.mubr.bf16.mxu1 %v1119_v15 }
  0xa5   : > { %1249 = vmatpush3.bf16.msra.mxu0 %v1441_v46 }
  0xa6   : > { %1271 = vmatpush3.bf16.msra.mxu1 %v1442_v47  ;;  %1250 = vmatprep.subr.bf16.mxu0 %v1443_v48 }
  0xa7   : > { %1272 = vmatprep.subr.bf16.mxu1 %v1444_v49 }
  0xa9   : > { %1251 = vmatpush3.bf16.msra.mxu0 %v1445_v50 }
  0xaa   : > { %1273 = vmatpush3.bf16.msra.mxu1 %v1446_v51  ;;  %1252 = vmatprep.subr.bf16.mxu0 %v1447_v52 }
  0xab   : > { %1274 = vmatprep.subr.bf16.mxu1 %v1448_v53 }
  0xad   : > { %1253 = vmatpush3.bf16.msra.mxu0 %v1449_v54 }
  0xae   : > { %1275 = vmatpush3.bf16.msra.mxu1 %v1450_v55  ;;  %1254 = vmatprep.subr.bf16.mxu0 %v1451_v56 }
  0xaf   : > { %1276 = vmatprep.subr.bf16.mxu1 %v1452_v57 }
  0xb1   : > { %1255 = vmatpush3.bf16.msra.mxu0 %v1453_v58 }
  0xb2   : > { %1277 = vmatpush3.bf16.msra.mxu1 %v1454_v59  ;;  %1256 = vmatprep.subr.bf16.mxu0 %v1455_v60 }
  0xb3   : > { %1278 = vmatprep.subr.bf16.mxu1 %v1456_v61 }
  0xb5   : > { %1257 = vmatpush3.bf16.msra.mxu0 %v1457_v62 }
  0xb6   : > { %1279 = vmatpush3.bf16.msra.mxu1 %v1458_v63  ;;  %1258 = vmatprep.subr.bf16.mxu0 %v1459_v0 }
  0xb7   : > { %1280 = vmatprep.subr.bf16.mxu1 %v1460_v1 }
  0xb9   : > { %1259 = vmatpush3.bf16.msra.mxu0 %v1461_v2 }
  0xba   : > { %1281 = vmatpush3.bf16.msra.mxu1 %v1462_v3  ;;  %1260 = vmatprep.subr.bf16.mxu0 %v1463_v4 }
  0xbb   : > { %1282 = vmatprep.subr.bf16.mxu1 %v1464_v5 }
  0xbd   : > { %1261 = vmatpush3.bf16.msra.mxu0 %v1465_v6 }
  0xbe   : > { %1283 = vmatpush3.bf16.msra.mxu1 %v1466_v7 }
  0xc0   : > { %927 = vmatmul.mubr.bf16.vlgmr.msra.gmra.mrb[4].mxu0 %v1116_v10 }
  0xc1   : > { %968 = vmatmul.mubr.bf16.vlgmr.msra.gmra.mrb[4].mxu1 %v1118_v14 }
 0x173   : > { %v1218_v16 = vpop.f32.mrb[0].mxu0 }
 0x174   : > { %v1240_v17 = vpop.f32.mrb[0].mxu1  ;;  %v1219_v19 = vpop.f32.mrb[1].mxu0 }
 0x175   : > { %v1220_v20 = vadd.f32 %v1219_v19, %v1218_v16  ;;  %v1241_v21 = vpop.f32.mrb[1].mxu1  ;;  %v1221_v22 = vpop.f32.mrb[2].mxu0 }
 0x176   : > { %v1242_v23 = vadd.f32 %v1241_v21, %v1240_v17  ;;  %v1243_v24 = vpop.f32.mrb[2].mxu1  ;;  %v1222_v25 = vpop.f32.mrb[3].mxu0 }
 0x177   : > { %v847_v26 = vadd.f32 %v1220_v20, %v1111_v18  ;;  %v1223_v27 = vadd.f32 %v1222_v25, %v1221_v22  ;;  %v1244_v28 = vpop.f32.mrb[3].mxu1 }
 0x178   : > { %v1245_v29 = vadd.f32 %v1244_v28, %v1243_v24 }
 0x179   : > { %v888_v30 = vadd.f32 %v1242_v23, %v847_v26  ;;  %v850_v31 = vadd.f32 %v1223_v27, %v1111_v18 }
 0x17b   : > { %v891_v32 = vadd.f32 %v1245_v29, %v850_v31 }
 0x193   : > { %v1262_v33 = vpop.f32.mrb[4].mxu0 }
 0x194   : > { %v1284_v34 = vpop.f32.mrb[4].mxu1  ;;  %v1263_v35 = vpop.f32.mrb[5].mxu0 }
 0x195   : > { %v1264_v36 = vadd.f32 %v1263_v35, %v1262_v33  ;;  %v1285_v37 = vpop.f32.mrb[5].mxu1  ;;  %v1265_v38 = vpop.f32.mrb[6].mxu0 }
 0x196   : > { %v1286_v39 = vadd.f32 %v1285_v37, %v1284_v34  ;;  %v1287_v40 = vpop.f32.mrb[6].mxu1  ;;  %v1266_v41 = vpop.f32.mrb[7].mxu0 }
 0x197   : > { %v929_v42 = vadd.f32 %v1264_v36, %v888_v30  ;;  %v1267_v43 = vadd.f32 %v1266_v41, %v1265_v38  ;;  %v1288_v44 = vpop.f32.mrb[7].mxu1 }
 0x198   : > { %v1289_v45 = vadd.f32 %v1288_v44, %v1287_v40 }
 0x199   : > { %v970_v46 = vadd.f32 %v1286_v39, %v929_v42  ;;  %v932_v47 = vadd.f32 %v1267_v43, %v891_v32 }
 0x19b   : > { %v973_v48 = vadd.f32 %v1289_v45, %v932_v47  ;;  %v976_v49 = vmax.f32 %v970_v46, 0.0 }
 0x19d   : > { %v977_v50 = vmax.f32 %v973_v48, 0.0 }
 0x19f   : > { %v1200_v51 = vpack.c.bf16 %v977_v50, %v976_v49 }
 0x1a1   : > { %1201 = vst [vmem:[%s239_s9] sm:$0xff] %v1200_v51  }
 0x1a2   : > { %1570 = shalt.err (!%p1567_p6)
}
 0x1a3   : > { %s1571_s28 = scalar_lea.hbm %s1966_s15, 128  ;;  %s1575_s11 = scalar_lea.hbm %s2026_s4, 256 }
 0x1a4   : > { %p1572_p5 = scmp.ne.s32.totalorder %s1966_s15, %s1571_s28  ;;  %p1576_p4 = scmp.lt.u32.totalorder %s1966_s15, %s2026_s4 }
 0x1a5   : > { %p1577_p3 = scmp.lt.u32.totalorder %s1575_s11, %s1571_s28  ;;  %p1579_p0 = scmp.lt.u32.totalorder %s1571_s28, %s1966_s15 }
 0x1a6   : > { %p1573_p1 = pnand %p1572_p5, %p2055_p10 }
 0x1a7   : > { %p1578_p13 = por %p1577_p3, %p1576_p4 }
 0x1a8   : > { %p1574_p2 = pneg %p1573_p1 }
 0x1a9   : > { %p1580_p11 = por %p1579_p0, %p1578_p13 }
 0x1ab   : > { %p1581_p8 = pnand %p1580_p11, %p1574_p2 }
 0x1ad   : > { %1584 = shalt.err (!%p1581_p8)
}
 0x1ae   : > { %s1681_s27 = smov 64   ;;  %s1682_s9 = smov 4  }
 0x1af   : > { %1296 = dma.vmem_to_hbm [thread:$0]  (%p2055_p10), %s1968_s6, 128, %s1966_s15, %s989_s16, %s1681_s27, %s1681_s27, %s1682_s9  }
 0x1b0 PF: > { %s1017_s12 = sand.u32 1, %s1659_s21   ;;  %p2056_p7 = scmp.ne.s32.totalorder %s2050_s25, 0 }
 0x1b1   : > { %p2057_p9 = scmp.ge.s32.totalorder %s1671_s0, 2  ;;  %s1018_s13 = scalar_lea.sflag [#allocation6], %s1017_s12 }
 0x1b3   : > { %p1310_p12 = pnand %p2057_p9, %p2056_p7 }
 0x1b5   : > { %1638 = dma.done.wait (!%p1310_p12), %s1018_s13, 128  }
 0x1b6   : > { %1640 = vsyncadd (!%p1310_p12), %s1018_s13, 4294967168  ;;  %s2058_s30 = smov %s1861_s19  ;;  %p19_p6 = scmp.ge.s32.totalorder %s1861_s19, 4  }
 0x1b7   : > { %s2059_s17 = smov %s1647_s18  ;;  %s2003_s18 = smov 0  }
 0x1b8   : > { %s2060_s19 = smov %s1655_s20  ;;  %s2008_s20 = smov 0  }
 0x1b9   : > { %s2061_s21 = smov %s1663_s22  ;;  %s2062_s22 = smov %s1667_s23 }
 0x1ba   : > { %s2063_s23 = smov %s1878_s10  ;;  %s2064_s0 = smov %s2058_s30 }
 0x1bb   :  { %21 = sbr.rel (!%p19_p6) target bundleno = 11 (0xb), region = 87 }
 0x1c2   :  { %1023 = vsyncpa [#allocation5], 1 }
 0x1c3   :  { %1025 = vsyncpa [#allocation5 + $0x1], 1 }
 0x1c4   :  { %1026 = vsyncpa [#allocation8], 1 }
 0x1c5   :  { %1027 = vsyncpa [#allocation6], 1 }
 0x1c6   :  { %1029 = vsyncpa [#allocation6 + $0x1], 1 }

// kernel: forward.5
= control target key start
LH: loop header
LB: loop body
LE: loop exit
PB: predicated region body
PF: predicated region fallthrough
CT: control target
= control target key end

     0   :  { %16 = vsyncpa [#allocation5], 0  ;;  %s2714_s0 = inlined_call_operand.<no memory space> [shape: s32[1], index: 0, kind: input, shape index: {}]   ;;  %s2715_s1 = inlined_call_operand.hbm [shape: bf16[1,16,1152], index: 1, kind: input, shape index: {}]   ;;  %s2716_s2 = inlined_call_operand.hbm [shape: bf16[6,1152,128], index: 2, kind: input, shape index: {}]   ;;  %s2717_s3 = inlined_call_operand.hbm [shape: f32[6,1,128], index: 3, kind: input, shape index: {}]   ;;  %s2718_s4 = inlined_call_operand.hbm [shape: bf16[6,64,64], index: 4, kind: input, shape index: {}]   ;;  %s2719_s5 = inlined_call_operand.hbm [shape: f32[6,1,64], index: 5, kind: input, shape index: {}]   ;;  %s2720_s6 = inlined_call_operand.hbm [shape: bf16[64,512], index: 6, kind: input, shape index: {}]   ;;  %s2721_s7 = inlined_call_operand.hbm [shape: f32[1,512], index: 7, kind: input, shape index: {}]   ;;  %s2722_s8 = inlined_call_operand.hbm [shape: bf16[6,512,128], index: 8, kind: input, shape index: {}]   ;;  %s2723_s9 = inlined_call_operand.hbm [shape: f32[6,1,128], index: 9, kind: input, shape index: {}]   ;;  %s2724_s10 = inlined_call_operand.hbm [shape: f32[16,128], index: 10, kind: output, shape index: {}]  }
   0x1   :  { %17 = vsyncpa [#allocation8], 0 }
   0x2   :  { %18 = vsyncpa [#allocation11], 0 }
   0x3   :  { %19 = vsyncpa [#allocation14], 0 }
   0x4   :  { %20 = vsyncpa [#allocation17], 0  ;;  %s2062_s15 = smul.u32 9216, %s2714_s0 }
   0x5   :  { %21 = vsyncpa [#allocation6], 0  ;;  %s2481_s16 = smov [#allocation7]   ;;  %s1882_s23 = sshll.u32 %s2714_s0, 9 }
   0x6   :  { %s43_s17 = sshll.u32 %s2481_s16, 4  ;;  %s42_s20 = scalar_lea.hbm %s2716_s2, %s2062_s15  ;;  %s44_s17 = int_to_ptr.vmem [resolvable:$true] %s43_s17 }
   0x7   :  { %s2237_s24 = scalar_lea.hbm %s42_s20, 9216  ;;  %s2239_s27 = scalar_lea.hbm %s2716_s2, 55296 }
   0x8   :  { %p2238_p0 = scmp.ne.s32.totalorder %s42_s20, %s2237_s24  ;;  %p2240_p1 = scmp.lt.u32.totalorder %s42_s20, %s2716_s2 }
   0x9   :  { %p2241_p2 = scmp.lt.u32.totalorder %s2239_s27, %s2237_s24  ;;  %p2243_p4 = scmp.lt.u32.totalorder %s2237_s24, %s42_s20 }
   0xb   :  { %p2242_p3 = por %p2241_p2, %p2240_p1 }
   0xd   :  { %p2244_p5 = por %p2243_p4, %p2242_p3 }
   0xf   :  { %p2245_p6 = pnand %p2244_p5, %p2238_p0 }
  0x11   :  { %2248 = shalt.err (!%p2245_p6)
}
  0x12   :  { %s2249_s30 = scalar_lea.vmem %s44_s17, 9216  ;;  %p2254_p8 = scmp.lt.s32.totalorder %s44_s17, %s44_s17 }
  0x13   :  { %p2250_p7 = scmp.ne.s32.totalorder %s44_s17, %s2249_s30  ;;  %p2255_p9 = scmp.lt.s32.totalorder %s2249_s30, %s2249_s30 }
  0x15   :  { %p2256_p10 = por %p2255_p9, %p2254_p8 }
  0x17   :  { %p2257_p11 = pnand %p2256_p10, %p2250_p7 }
  0x19   :  { %2260 = shalt.err (!%p2257_p11)
}
  0x1a   :  { %s2482_s11 = smov 64   ;;  %s2483_s12 = smov 4  }
  0x1b   :  { %49 = dma.hbm_to_vmem [thread:$0]  %s42_s20, 9216, %s44_s17, [#allocation8], %s2482_s11, %s2482_s11, %s2483_s12  }
  0x1c   :  { %s71_s14 = scalar_lea.hbm %s2718_s4, %s1882_s23  ;;  %s2484_s15 = smov [#allocation10]  }
  0x1d   :  { %s72_s16 = sshll.u32 %s2484_s15, 4  ;;  %s2485_s18 = smov [#allocation13]   ;;  %s73_s16 = int_to_ptr.vmem [resolvable:$true] %s72_s16 }
  0x1e   :  { %s97_s19 = sshll.u32 %s2485_s18, 4  ;;  %s2261_s21 = scalar_lea.hbm %s71_s14, 512  ;;  %s98_s19 = int_to_ptr.vmem [resolvable:$true] %s97_s19 }
  0x1f   :  { %p2262_p12 = scmp.ne.s32.totalorder %s71_s14, %s2261_s21  ;;  %s2263_s25 = scalar_lea.hbm %s2718_s4, 3072 }
  0x20   :  { %p2264_p13 = scmp.lt.u32.totalorder %s71_s14, %s2718_s4  ;;  %p2265_p0 = scmp.lt.u32.totalorder %s2263_s25, %s2261_s21 }
  0x21   :  { %p2267_p2 = scmp.lt.u32.totalorder %s2261_s21, %s71_s14 }
  0x22   :  { %p2266_p1 = por %p2265_p0, %p2264_p13 }
  0x24   :  { %p2268_p3 = por %p2267_p2, %p2266_p1 }
  0x26   :  { %p2269_p4 = pnand %p2268_p3, %p2262_p12 }
  0x28   :  { %2272 = shalt.err (!%p2269_p4)
}
  0x29   :  { %s2273_s17 = scalar_lea.vmem %s73_s16, 512  ;;  %p2278_p6 = scmp.lt.s32.totalorder %s73_s16, %s73_s16 }
  0x2a   :  { %p2274_p5 = scmp.ne.s32.totalorder %s73_s16, %s2273_s17  ;;  %p2279_p7 = scmp.lt.s32.totalorder %s2273_s17, %s2273_s17 }
  0x2c   :  { %p2280_p8 = por %p2279_p7, %p2278_p6 }
  0x2e   :  { %p2281_p9 = pnand %p2280_p8, %p2274_p5 }
  0x30   :  { %2284 = shalt.err (!%p2281_p9)
}
  0x31   :  { %78 = dma.hbm_to_vmem [thread:$0]  %s71_s14, 512, %s73_s16, [#allocation11], %s2482_s11, %s2482_s11, %s2483_s12  }
  0x32   :  { %s1883_s23 = sshll.u32 %s2714_s0, 12  ;;  %s2285_s30 = scalar_lea.hbm %s2720_s6, 2048 }
  0x33   :  { %p2286_p10 = scmp.ne.s32.totalorder %s2720_s6, %s2285_s30  ;;  %p2289_p11 = scmp.lt.u32.totalorder %s2285_s30, %s2720_s6 }
  0x35   :  { %p2291_p12 = pnand %p2289_p11, %p2286_p10 }
  0x37   :  { %2294 = shalt.err (!%p2291_p12)
}
  0x38   :  { %s2295_s14 = scalar_lea.vmem %s98_s19, 2048  ;;  %p2300_p0 = scmp.lt.s32.totalorder %s98_s19, %s98_s19 }
  0x39   :  { %p2296_p13 = scmp.ne.s32.totalorder %s98_s19, %s2295_s14  ;;  %p2301_p1 = scmp.lt.s32.totalorder %s2295_s14, %s2295_s14 }
  0x3b   :  { %p2302_p2 = por %p2301_p1, %p2300_p0 }
  0x3d   :  { %p2303_p3 = pnand %p2302_p2, %p2296_p13 }
  0x3f   :  { %2306 = shalt.err (!%p2303_p3)
}
  0x40   :  { %s2486_s16 = smov 256   ;;  %s2487_s21 = smov 16  }
  0x41   :  { %103 = dma.hbm_to_vmem [thread:$0]  %s2720_s6, 2048, %s98_s19, [#allocation14], %s2486_s16, %s2486_s16, %s2487_s21  }
  0x42   :  { %s122_s27 = scalar_lea.hbm %s2722_s8, %s1883_s23  ;;  %s2488_s17 = smov [#allocation16]  }
  0x43   :  { %s123_s20 = sshll.u32 %s2488_s17, 4  ;;  %s2489_s4 = smov [#allocation4]   ;;  %s124_s20 = int_to_ptr.vmem [resolvable:$true] %s123_s20 }
  0x44   :  { %s27_s28 = sshll.u32 %s2489_s4, 4  ;;  %s2307_s29 = scalar_lea.hbm %s122_s27, 4096  ;;  %s28_s28 = int_to_ptr.vmem [resolvable:$true] %s27_s28 }
  0x45   :  { %p2308_p4 = scmp.ne.s32.totalorder %s122_s27, %s2307_s29  ;;  %s2309_s13 = scalar_lea.hbm %s2722_s8, 24576 }
  0x46   :  { %p2310_p5 = scmp.lt.u32.totalorder %s122_s27, %s2722_s8  ;;  %p2311_p6 = scmp.lt.u32.totalorder %s2309_s13, %s2307_s29 }
  0x47   :  { %p2313_p8 = scmp.lt.u32.totalorder %s2307_s29, %s122_s27 }
  0x48   :  { %p2312_p7 = por %p2311_p6, %p2310_p5 }
  0x4a   :  { %p2314_p9 = por %p2313_p8, %p2312_p7 }
  0x4c   :  { %p2315_p10 = pnand %p2314_p9, %p2308_p4 }
  0x4e   :  { %2318 = shalt.err (!%p2315_p10)
}
  0x4f   :  { %s2319_s6 = scalar_lea.vmem %s124_s20, 4096  ;;  %p2324_p12 = scmp.lt.s32.totalorder %s124_s20, %s124_s20 }
  0x50   :  { %p2320_p11 = scmp.ne.s32.totalorder %s124_s20, %s2319_s6  ;;  %p2325_p13 = scmp.lt.s32.totalorder %s2319_s6, %s2319_s6 }
  0x52   :  { %p2326_p0 = por %p2325_p13, %p2324_p12 }
  0x54   :  { %p2327_p1 = pnand %p2326_p0, %p2320_p11 }
  0x56   :  { %2330 = shalt.err (!%p2327_p1)
}
  0x57   :  { %129 = dma.hbm_to_vmem [thread:$0]  %s122_s27, 4096, %s124_s20, [#allocation17], %s2482_s11, %s2482_s11, %s2483_s12  }
  0x58   :  { %s2617_s23 = sshll.u32 %s2714_s0, 4  ;;  %s2331_s21 = scalar_lea.hbm %s2715_s1, 1152 }
  0x59   :  { %p2332_p2 = scmp.ne.s32.totalorder %s2715_s1, %s2331_s21  ;;  %p2335_p3 = scmp.lt.u32.totalorder %s2331_s21, %s2715_s1 }
  0x5b   :  { %p2337_p4 = pnand %p2335_p3, %p2332_p2 }
  0x5d   :  { %2340 = shalt.err (!%p2337_p4)
}
  0x5e   :  { %s2341_s12 = scalar_lea.vmem %s28_s28, 1152  ;;  %p2346_p6 = scmp.lt.s32.totalorder %s28_s28, %s28_s28 }
  0x5f   :  { %p2342_p5 = scmp.ne.s32.totalorder %s28_s28, %s2341_s12  ;;  %p2347_p7 = scmp.lt.s32.totalorder %s2341_s12, %s2341_s12 }
  0x61   :  { %p2348_p8 = por %p2347_p7, %p2346_p6 }
  0x63   :  { %p2349_p9 = pnand %p2348_p8, %p2342_p5 }
  0x65   :  { %2352 = shalt.err (!%p2349_p9)
}
  0x66   :  { %s2490_s0 = smov 576   ;;  %s2491_s27 = smov 36  }
  0x67   :  { %33 = dma.hbm_to_vmem [thread:$0]  %s2715_s1, 1152, %s28_s28, [#allocation5], %s2490_s0, %s2490_s0, %s2491_s27  }
  0x68   :  { %s57_s30 = scalar_lea.hbm %s2717_s3, %s2617_s23  ;;  %s2492_s2 = smov [#allocation9]  }
  0x69   :  { %s59_s13 = sshll.u32 %s2492_s2, 4  ;;  %s2639_s6 = scalar_lea.hbm %s2719_s5, %s2617_s23  ;;  %s60_s13 = int_to_ptr.vmem [resolvable:$true] %s59_s13 }
  0x6a   :  { %s2353_s19 = scalar_lea.hbm %s57_s30, 16  ;;  %s2355_s16 = scalar_lea.hbm %s2717_s3, 96 }
  0x6b   :  { %p2354_p10 = scmp.ne.s32.totalorder %s57_s30, %s2353_s19  ;;  %p2356_p11 = scmp.lt.u32.totalorder %s57_s30, %s2717_s3 }
  0x6c   :  { %p2357_p12 = scmp.lt.u32.totalorder %s2355_s16, %s2353_s19  ;;  %p2359_p0 = scmp.lt.u32.totalorder %s2353_s19, %s57_s30 }
  0x6e   :  { %p2358_p13 = por %p2357_p12, %p2356_p11 }
  0x70   :  { %p2360_p1 = por %p2359_p0, %p2358_p13 }
  0x72   :  { %p2361_p2 = pnand %p2360_p1, %p2354_p10 }
  0x74   :  { %2364 = shalt.err (!%p2361_p2)
}
  0x75   :  { %s2365_s28 = scalar_lea.vmem %s60_s13, 16  ;;  %s2369_s22 = scalar_lea.vmem %s60_s13, 32 }
  0x76   :  { %p2366_p3 = scmp.ne.s32.totalorder %s60_s13, %s2365_s28  ;;  %p2370_p4 = scmp.lt.s32.totalorder %s60_s13, %s60_s13 }
  0x77   :  { %p2371_p5 = scmp.lt.s32.totalorder %s2369_s22, %s2365_s28 }
  0x79   :  { %p2372_p6 = por %p2371_p5, %p2370_p4 }
  0x7b   :  { %p2373_p7 = pnand %p2372_p6, %p2366_p3 }
  0x7d   :  { %2376 = shalt.err (!%p2373_p7)
}
  0x7e   :  { %62 = dma.hbm_to_vmem [thread:$0]  %s57_s30, 16, %s60_s13, [#allocation8]  }
  0x7f   :  { %s2493_s3 = smov [#allocation12]   ;;  %s2494_s25 = smov [#allocation15]  }
  0x80   :  { %s88_s24 = sshll.u32 %s2493_s3, 4  ;;  %s110_s26 = sshll.u32 %s2494_s25, 4  ;;  %s89_s24 = int_to_ptr.vmem [resolvable:$true] %s88_s24  ;;  %s111_s26 = int_to_ptr.vmem [resolvable:$true] %s110_s26 }
  0x81   :  { %s2377_s12 = scalar_lea.hbm %s2639_s6, 16  ;;  %s2379_s17 = scalar_lea.hbm %s2719_s5, 96 }
  0x82   :  { %p2378_p8 = scmp.ne.s32.totalorder %s2639_s6, %s2377_s12  ;;  %p2380_p9 = scmp.lt.u32.totalorder %s2639_s6, %s2719_s5 }
  0x83   :  { %p2381_p10 = scmp.lt.u32.totalorder %s2379_s17, %s2377_s12  ;;  %p2383_p12 = scmp.lt.u32.totalorder %s2377_s12, %s2639_s6 }
  0x85   :  { %p2382_p11 = por %p2381_p10, %p2380_p9 }
  0x87   :  { %p2384_p13 = por %p2383_p12, %p2382_p11 }
  0x89   :  { %p2385_p0 = pnand %p2384_p13, %p2378_p8 }
  0x8b   :  { %2388 = shalt.err (!%p2385_p0)
}
  0x8c   :  { %s2389_s29 = scalar_lea.vmem %s89_s24, 16  ;;  %s2393_s30 = scalar_lea.vmem %s89_s24, 32 }
  0x8d   :  { %p2390_p1 = scmp.ne.s32.totalorder %s89_s24, %s2389_s29  ;;  %p2394_p2 = scmp.lt.s32.totalorder %s89_s24, %s89_s24 }
  0x8e   :  { %p2395_p3 = scmp.lt.s32.totalorder %s2393_s30, %s2389_s29 }
  0x90   :  { %p2396_p4 = por %p2395_p3, %p2394_p2 }
  0x92   :  { %p2397_p5 = pnand %p2396_p4, %p2390_p1 }
  0x94   :  { %2400 = shalt.err (!%p2397_p5)
}
  0x95   :  { %91 = dma.hbm_to_vmem [thread:$0]  %s2639_s6, 16, %s89_s24, [#allocation11]  }
  0x96   :  { %s2401_s5 = scalar_lea.hbm %s2721_s7, 64 }
  0x97   :  { %p2402_p6 = scmp.ne.s32.totalorder %s2721_s7, %s2401_s5  ;;  %p2405_p7 = scmp.lt.u32.totalorder %s2401_s5, %s2721_s7 }
  0x99   :  { %p2407_p8 = pnand %p2405_p7, %p2402_p6 }
  0x9b   :  { %2410 = shalt.err (!%p2407_p8)
}
  0x9c   :  { %s2411_s14 = scalar_lea.vmem %s111_s26, 64  ;;  %p2416_p10 = scmp.lt.s32.totalorder %s111_s26, %s111_s26 }
  0x9d   :  { %p2412_p9 = scmp.ne.s32.totalorder %s111_s26, %s2411_s14  ;;  %p2417_p11 = scmp.lt.s32.totalorder %s2411_s14, %s2411_s14 }
  0x9f   :  { %p2418_p12 = por %p2417_p11, %p2416_p10 }
  0xa1   :  { %p2419_p13 = pnand %p2418_p12, %p2412_p9 }
  0xa3   :  { %2422 = shalt.err (!%p2419_p13)
}
  0xa4   :  { %113 = dma.hbm_to_vmem [thread:$0]  %s2721_s7, 64, %s111_s26, [#allocation14]  }
  0xa5   :  { %s137_s28 = scalar_lea.hbm %s2723_s9, %s2617_s23  ;;  %s2495_s22 = smov [#allocation18]  }
  0xa6   :  { %s139_s3 = sshll.u32 %s2495_s22, 4  ;;  %s2423_s24 = scalar_lea.hbm %s137_s28, 16  ;;  %s140_s3 = int_to_ptr.vmem [resolvable:$true] %s139_s3 }
  0xa7   :  { %p2424_p0 = scmp.ne.s32.totalorder %s137_s28, %s2423_s24  ;;  %s2425_s0 = scalar_lea.hbm %s2723_s9, 96 }
  0xa8   :  { %p2426_p1 = scmp.lt.u32.totalorder %s137_s28, %s2723_s9  ;;  %p2427_p2 = scmp.lt.u32.totalorder %s2425_s0, %s2423_s24 }
  0xa9   :  { %p2429_p4 = scmp.lt.u32.totalorder %s2423_s24, %s137_s28 }
  0xaa   :  { %p2428_p3 = por %p2427_p2, %p2426_p1 }
  0xac   :  { %p2430_p5 = por %p2429_p4, %p2428_p3 }
  0xae   :  { %p2431_p6 = pnand %p2430_p5, %p2424_p0 }
  0xb0   :  { %2434 = shalt.err (!%p2431_p6)
}
  0xb1   :  { %s2435_s7 = scalar_lea.vmem %s140_s3, 16  ;;  %s2439_s23 = scalar_lea.vmem %s140_s3, 32 }
  0xb2   :  { %p2436_p7 = scmp.ne.s32.totalorder %s140_s3, %s2435_s7  ;;  %p2440_p8 = scmp.lt.s32.totalorder %s140_s3, %s140_s3 }
  0xb3   :  { %p2441_p9 = scmp.lt.s32.totalorder %s2439_s23, %s2435_s7 }
  0xb5   :  { %p2442_p10 = por %p2441_p9, %p2440_p8 }
  0xb7   :  { %p2443_p11 = pnand %p2442_p10, %p2436_p7 }
  0xb9   :  { %2446 = shalt.err (!%p2443_p11)
}
  0xba   :  { %142 = dma.hbm_to_vmem [thread:$0]  %s137_s28, 16, %s140_s3, [#allocation17]  }
  0xbb   :  { %2469 = dma.done.wait [#allocation5], 1152  }
  0xbc   :  { %2470 = vsyncadd [#allocation5], 4294966144 }
  0xbd   :  { %2471 = dma.done.wait [#allocation8], 9232  }
  0xbe   :  { %2472 = vsyncadd [#allocation8], 4294958064 }
  0xbf   :  { %2473 = dma.done.wait [#allocation11], 528  }
  0xc0   :  { %2474 = vsyncadd [#allocation11], 4294966768 }
  0xc1   :  { %2475 = dma.done.wait [#allocation14], 2112  }
  0xc2   :  { %2476 = vsyncadd [#allocation14], 4294965184 }
  0xc3   :  { %2477 = dma.done.wait [#allocation17], 4112  }
  0xc4   :  { %2478 = vsyncadd [#allocation17], 4294963184  ;;  %v2084_v0 = vld [vmem:[#allocation7 + $0x40] sm:$0xff]   ;;  %v2088_v4 = vld [vmem:[#allocation7 + $0x48] sm:$0xff]   ;;  %vm2497_vm0 = vmmov 0   ;;  %vm1066_vm1 = vcmask 523264  }
  0xc5   :  { %v2085_v1 = vld [vmem:[#allocation7] sm:$0xff]   ;;  %1884 = vmatprep.subr.bf16.mxu0 %v2084_v0  ;;  %v2089_v5 = vld [vmem:[#allocation7 + $0x8] sm:$0xff]   ;;  %v2092_v8 = vld [vmem:[#allocation7 + $0x50] sm:$0xff]   ;;  %s2499_s9 = smov [#allocation19]  }
  0xc6   :  { %v2086_v2 = vld [vmem:[#allocation7 + $0xc0] sm:$0xff]   ;;  %1885 = vmatpush3.bf16.msra.mxu0 %v2085_v1  ;;  %v2090_v6 = vld [vmem:[#allocation7 + $0xc8] sm:$0xff]   ;;  %v2093_v9 = vld [vmem:[#allocation7 + $0x10] sm:$0xff]  }
  0xc7   :  { %v2087_v3 = vld [vmem:[#allocation7 + $0x80] sm:$0xff]   ;;  %1906 = vmatprep.subr.bf16.mxu1 %v2086_v2  ;;  %1886 = vmatprep.subr.bf16.mxu0 %v2088_v4  ;;  %v2091_v7 = vld [vmem:[#allocation7 + $0x88] sm:$0xff]   ;;  %v2094_v10 = vld [vmem:[#allocation7 + $0xd0] sm:$0xff]  }
  0xc8   :  { %1907 = vmatpush3.bf16.msra.mxu1 %v2087_v3  ;;  %v2095_v11 = vld [vmem:[#allocation7 + $0x90] sm:$0xff]   ;;  %v2096_v12 = vld [vmem:[#allocation7 + $0x58] sm:$0xff]   ;;  %v2100_v16 = vld [vmem:[#allocation7 + $0x60] sm:$0xff]  }
  0xc9   :  { %1908 = vmatprep.subr.bf16.mxu1 %v2090_v6  ;;  %v2097_v13 = vld [vmem:[#allocation7 + $0x18] sm:$0xff]   ;;  %v2101_v17 = vld [vmem:[#allocation7 + $0x20] sm:$0xff]   ;;  %v2104_v20 = vld [vmem:[#allocation7 + $0x68] sm:$0xff]   ;;  %v2496_v6 = vmov 0.0  }
  0xca   :  { %1887 = vmatpush3.bf16.msra.mxu0 %v2089_v5  ;;  %v2098_v14 = vld [vmem:[#allocation7 + $0xd8] sm:$0xff]   ;;  %v2102_v18 = vld [vmem:[#allocation7 + $0xe0] sm:$0xff]   ;;  %v2105_v21 = vld [vmem:[#allocation7 + $0x28] sm:$0xff]  }
  0xcb   :  { %1888 = vmatprep.subr.bf16.mxu0 %v2092_v8  ;;  %v2099_v15 = vld [vmem:[#allocation7 + $0x98] sm:$0xff]   ;;  %v2103_v19 = vld [vmem:[#allocation7 + $0xa0] sm:$0xff]   ;;  %v2106_v22 = vld [vmem:[#allocation7 + $0xe8] sm:$0xff]  }
  0xcc   :  { %1909 = vmatpush3.bf16.msra.mxu1 %v2091_v7  ;;  %v2107_v23 = vld [vmem:[#allocation7 + $0xa8] sm:$0xff]   ;;  %v2108_v24 = vld [vmem:[#allocation7 + $0x70] sm:$0xff]   ;;  %v2112_v28 = vld [vmem:[#allocation7 + $0x78] sm:$0xff]  }
  0xcd   :  { %1910 = vmatprep.subr.bf16.mxu1 %v2094_v10  ;;  %v2109_v25 = vld [vmem:[#allocation7 + $0x30] sm:$0xff]   ;;  %v2113_v29 = vld [vmem:[#allocation7 + $0x38] sm:$0xff]   ;;  %v2119_v34 = vld [vmem:[#allocation7 + $0x140] sm:$0xff]  }
  0xce   :  { %1889 = vmatpush3.bf16.msra.mxu0 %v2093_v9  ;;  %v2110_v26 = vld [vmem:[#allocation7 + $0xf0] sm:$0xff]   ;;  %v2114_v30 = vld [vmem:[#allocation7 + $0xf8] sm:$0xff]   ;;  %v2120_v35 = vld [vmem:[#allocation4 + $0x8] ss:$36 sps:$4 sm:$0xff]  }
  0xcf   :  { %1890 = vmatprep.subr.bf16.mxu0 %v2096_v12  ;;  %v2111_v27 = vld [vmem:[#allocation7 + $0xb0] sm:$0xff]   ;;  %v2115_v31 = vld [vmem:[#allocation4] ss:$36 sps:$4 sm:$0xff]   ;;  %v2122_v36 = vld [vmem:[#allocation4 + $0xc] ss:$36 sps:$4 sm:$0xff]  }
  0xd0   :  { %1911 = vmatpush3.bf16.msra.mxu1 %v2095_v11  ;;  %v2117_v32 = vld [vmem:[#allocation4 + $0x4] ss:$36 sps:$4 sm:$0xff]   ;;  %889 = vmatprep.mubr.bf16.mxu1 %v2122_v36  ;;  %v2126_v40 = vld [vmem:[#allocation7 + $0x148] sm:$0xff]   ;;  %v2130_v44 = vld [vmem:[#allocation7 + $0x150] sm:$0xff]  }
  0xd1   :  { %1912 = vmatprep.subr.bf16.mxu1 %v2098_v14  ;;  %v2118_v33 = vld [vmem:[#allocation7 + $0xb8] sm:$0xff]   ;;  %848 = vmatprep.mubr.bf16.mxu0 %v2117_v32  ;;  %v2123_v37 = vld [vmem:[#allocation7 + $0x100] sm:$0xff]   ;;  %v2127_v41 = vld [vmem:[#allocation7 + $0x108] sm:$0xff]  }
  0xd2   :  { %1891 = vmatpush3.bf16.msra.mxu0 %v2097_v13  ;;  %v2124_v38 = vld [vmem:[#allocation7 + $0x1c0] sm:$0xff]   ;;  %v2128_v42 = vld [vmem:[#allocation7 + $0x1c8] sm:$0xff]   ;;  %v2131_v45 = vld [vmem:[#allocation7 + $0x110] sm:$0xff]  }
  0xd3   :  { %1892 = vmatprep.subr.bf16.mxu0 %v2100_v16  ;;  %v2125_v39 = vld [vmem:[#allocation7 + $0x180] sm:$0xff]   ;;  %v2129_v43 = vld [vmem:[#allocation7 + $0x188] sm:$0xff]   ;;  %v2132_v46 = vld [vmem:[#allocation7 + $0x1d0] sm:$0xff]  }
  0xd4   :  { %1913 = vmatpush3.bf16.msra.mxu1 %v2099_v15  ;;  %v2133_v47 = vld [vmem:[#allocation7 + $0x190] sm:$0xff]   ;;  %v2134_v48 = vld [vmem:[#allocation7 + $0x158] sm:$0xff]   ;;  %v2138_v52 = vld [vmem:[#allocation7 + $0x160] sm:$0xff]  }
  0xd5   :  { %1914 = vmatprep.subr.bf16.mxu1 %v2102_v18  ;;  %v2135_v49 = vld [vmem:[#allocation7 + $0x118] sm:$0xff]   ;;  %v2139_v53 = vld [vmem:[#allocation7 + $0x120] sm:$0xff]   ;;  %v2142_v56 = vld [vmem:[#allocation7 + $0x168] sm:$0xff]  }
  0xd6   :  { %1893 = vmatpush3.bf16.msra.mxu0 %v2101_v17  ;;  %v2136_v50 = vld [vmem:[#allocation7 + $0x1d8] sm:$0xff]   ;;  %v2140_v54 = vld [vmem:[#allocation7 + $0x1e0] sm:$0xff]   ;;  %v2143_v57 = vld [vmem:[#allocation7 + $0x128] sm:$0xff]  }
  0xd7   :  { %1894 = vmatprep.subr.bf16.mxu0 %v2104_v20  ;;  %v2137_v51 = vld [vmem:[#allocation7 + $0x198] sm:$0xff]   ;;  %v2141_v55 = vld [vmem:[#allocation7 + $0x1a0] sm:$0xff]   ;;  %v2144_v58 = vld [vmem:[#allocation7 + $0x1e8] sm:$0xff]  }
  0xd8   :  { %1915 = vmatpush3.bf16.msra.mxu1 %v2103_v19  ;;  %v2145_v59 = vld [vmem:[#allocation7 + $0x1a8] sm:$0xff]   ;;  %v2146_v60 = vld [vmem:[#allocation7 + $0x170] sm:$0xff]   ;;  %v2150_v0 = vld [vmem:[#allocation7 + $0x178] sm:$0xff]  }
  0xd9   :  { %1916 = vmatprep.subr.bf16.mxu1 %v2106_v22  ;;  %v2147_v61 = vld [vmem:[#allocation7 + $0x130] sm:$0xff]   ;;  %v2151_v1 = vld [vmem:[#allocation7 + $0x138] sm:$0xff]   ;;  %v2153_v3 = vld [vmem:[#allocation4 + $0x10] ss:$36 sps:$4 sm:$0xff]  }
  0xda   :  { %1895 = vmatpush3.bf16.msra.mxu0 %v2105_v21  ;;  %v2148_v62 = vld [vmem:[#allocation7 + $0x1f0] sm:$0xff]   ;;  %v2152_v2 = vld [vmem:[#allocation7 + $0x1f8] sm:$0xff]   ;;  %v2160_v9 = vld [vmem:[#allocation7 + $0x200] sm:$0xff]  }
  0xdb   :  { %1896 = vmatprep.subr.bf16.mxu0 %v2108_v24  ;;  %v2149_v63 = vld [vmem:[#allocation7 + $0x1b0] sm:$0xff]   ;;  %v2156_v5 = vld [vmem:[#allocation7 + $0x1b8] sm:$0xff]   ;;  %v2161_v10 = vld [vmem:[#allocation7 + $0x208] sm:$0xff]  }
  0xdc   :  { %1917 = vmatpush3.bf16.msra.mxu1 %v2107_v23  ;;  %v2155_v4 = vld [vmem:[#allocation4 + $0x14] ss:$36 sps:$4 sm:$0xff]   ;;  %v2159_v8 = vld [vmem:[#allocation4 + $0x1c] ss:$36 sps:$4 sm:$0xff]   ;;  %v2164_v13 = vld [vmem:[#allocation7 + $0x220] sm:$0xff]  }
  0xdd   :  { %1918 = vmatprep.subr.bf16.mxu1 %v2110_v26  ;;  %v2157_v7 = vld [vmem:[#allocation4 + $0x18] ss:$36 sps:$4 sm:$0xff]   ;;  %v2163_v12 = vld [vmem:[#allocation7 + $0x218] sm:$0xff]   ;;  %v2165_v14 = vld [vmem:[#allocation7 + $0x228] sm:$0xff]  }
  0xde   :  { %1897 = vmatpush3.bf16.msra.mxu0 %v2109_v25  ;;  %v2162_v11 = vld [vmem:[#allocation7 + $0x210] sm:$0xff]   ;;  %v2167_v16 = vld [vmem:[#allocation7 + $0x238] sm:$0xff]   ;;  %v2169_v18 = vld [vmem:[#allocation10] sm:$0xff]  }
  0xdf   :  { %1898 = vmatprep.subr.bf16.mxu0 %v2112_v28  ;;  %v2166_v15 = vld [vmem:[#allocation7 + $0x230] sm:$0xff]   ;;  %v2168_v17 = vld [vmem:[#allocation4 + $0x20] ss:$36 sps:$4 sm:$0xff]   ;;  %v1743_v23 = vld [vmem:[#allocation9] ss:$0 sm:$0xff] }
  0xe0   :  { %1919 = vmatpush3.bf16.msra.mxu1 %v2111_v27  ;;  %v2170_v19 = vld [vmem:[#allocation10 + $0x8] sm:$0xff]   ;;  %v2171_v20 = vld [vmem:[#allocation10 + $0x10] sm:$0xff]   ;;  %v2172_v21 = vld [vmem:[#allocation10 + $0x18] sm:$0xff]  }
  0xe1   :  { %1920 = vmatprep.subr.bf16.mxu1 %v2114_v30 }
  0xe2   :  { %1899 = vmatpush3.bf16.msra.mxu0 %v2113_v29 }
  0xe3   :  { %1928 = vmatprep.subr.bf16.mxu0 %v2119_v34 }
  0xe4   :  { %1921 = vmatpush3.bf16.msra.mxu1 %v2118_v33 }
  0xe5   :  { %849 = vmatmul.mubr.bf16.vlgmr.msra.gmra.mrb[0].mxu0 %v2115_v31  ;;  %1950 = vmatprep.subr.bf16.mxu1 %v2124_v38 }
  0xe6   :  { %1929 = vmatpush3.bf16.msra.mxu0 %v2123_v37  ;;  %930 = vmatprep.mubr.bf16.mxu0 %v2155_v4 }
  0xe7   :  { %890 = vmatmul.mubr.bf16.vlgmr.msra.gmra.mrb[0].mxu1 %v2120_v35  ;;  %1930 = vmatprep.subr.bf16.mxu0 %v2126_v40 }
  0xe8   :  { %1951 = vmatpush3.bf16.msra.mxu1 %v2125_v39  ;;  %971 = vmatprep.mubr.bf16.mxu1 %v2159_v8 }
  0xe9   :  { %1952 = vmatprep.subr.bf16.mxu1 %v2128_v42 }
  0xea   :  { %1931 = vmatpush3.bf16.msra.mxu0 %v2127_v41 }
  0xeb   :  { %1932 = vmatprep.subr.bf16.mxu0 %v2130_v44 }
  0xec   :  { %1953 = vmatpush3.bf16.msra.mxu1 %v2129_v43 }
  0xed   :  { %1954 = vmatprep.subr.bf16.mxu1 %v2132_v46 }
  0xee   :  { %1933 = vmatpush3.bf16.msra.mxu0 %v2131_v45 }
  0xef   :  { %1934 = vmatprep.subr.bf16.mxu0 %v2134_v48 }
  0xf0   :  { %1955 = vmatpush3.bf16.msra.mxu1 %v2133_v47 }
  0xf1   :  { %1956 = vmatprep.subr.bf16.mxu1 %v2136_v50 }
  0xf2   :  { %1935 = vmatpush3.bf16.msra.mxu0 %v2135_v49 }
  0xf3   :  { %1936 = vmatprep.subr.bf16.mxu0 %v2138_v52 }
  0xf4   :  { %1957 = vmatpush3.bf16.msra.mxu1 %v2137_v51 }
  0xf5   :  { %1958 = vmatprep.subr.bf16.mxu1 %v2140_v54 }
  0xf6   :  { %1937 = vmatpush3.bf16.msra.mxu0 %v2139_v53 }
  0xf7   :  { %1938 = vmatprep.subr.bf16.mxu0 %v2142_v56 }
  0xf8   :  { %1959 = vmatpush3.bf16.msra.mxu1 %v2141_v55 }
  0xf9   :  { %1960 = vmatprep.subr.bf16.mxu1 %v2144_v58 }
  0xfa   :  { %1939 = vmatpush3.bf16.msra.mxu0 %v2143_v57 }
  0xfb   :  { %1940 = vmatprep.subr.bf16.mxu0 %v2146_v60 }
  0xfc   :  { %1961 = vmatpush3.bf16.msra.mxu1 %v2145_v59 }
  0xfd   :  { %1962 = vmatprep.subr.bf16.mxu1 %v2148_v62 }
  0xfe   :  { %1941 = vmatpush3.bf16.msra.mxu0 %v2147_v61 }
  0xff   :  { %1942 = vmatprep.subr.bf16.mxu0 %v2150_v0 }
 0x100   :  { %1963 = vmatpush3.bf16.msra.mxu1 %v2149_v63 }
 0x101   :  { %1964 = vmatprep.subr.bf16.mxu1 %v2152_v2 }
 0x102   :  { %1943 = vmatpush3.bf16.msra.mxu0 %v2151_v1  ;;  %v1825_v1 = vld [vmem:[#allocation12] ss:$0 sm:$0xff] }
 0x103   :  { %2030 = vmatprep.subr.bf16.mxu0 %v2496_v6 }
 0x104   :  { %1965 = vmatpush3.bf16.msra.mxu1 %v2156_v5 }
 0x105   :  { %931 = vmatmul.mubr.bf16.vlgmr.msra.gmra.mrb[4].mxu0 %v2153_v3  ;;  %2050 = vmatprep.subr.bf16.mxu1 %v2496_v6 }
 0x106   :  { %2046 = vmatprep.mubr.msk.bf16.mxu0 %vm2497_vm0, %v2496_v6  ;;  %2031 = vmatpush3.bf16.msra.mxu0 %v2160_v9 }
 0x107   :  { %972 = vmatmul.mubr.bf16.vlgmr.msra.gmra.mrb[4].mxu1 %v2157_v7  ;;  %2032 = vmatprep.subr.bf16.mxu0 %v2496_v6 }
 0x108   :  { %2058 = vmatprep.mubr.msk.bf16.mxu1 %vm2497_vm0, %v2496_v6  ;;  %2051 = vmatpush3.bf16.msra.mxu1 %v2169_v18 }
 0x109   :  { %2052 = vmatprep.subr.bf16.mxu1 %v2496_v6 }
 0x10a   :  { %2033 = vmatpush3.bf16.msra.mxu0 %v2161_v10 }
 0x10b   :  { %2034 = vmatprep.subr.bf16.mxu0 %v2496_v6 }
 0x10c   :  { %2053 = vmatpush3.bf16.msra.mxu1 %v2170_v19 }
 0x10d   :  { %2054 = vmatprep.subr.bf16.mxu1 %v2496_v6 }
 0x10e   :  { %2035 = vmatpush3.bf16.msra.mxu0 %v2162_v11 }
 0x10f   :  { %2036 = vmatprep.subr.bf16.mxu0 %v2496_v6 }
 0x110   :  { %2055 = vmatpush3.bf16.msra.mxu1 %v2171_v20  ;;  %v2175_v20 = vld [vmem:[#allocation13 + $0x4] ss:$16 sps:$4 sm:$0xff]  }
 0x111   :  { %2056 = vmatprep.subr.bf16.mxu1 %v2496_v6 }
 0x112   :  { %2037 = vmatpush3.bf16.msra.mxu0 %v2163_v12 }
 0x113   :  { %2038 = vmatprep.subr.bf16.mxu0 %v2496_v6 }
 0x114   :  { %2057 = vmatpush3.bf16.msra.mxu1 %v2172_v21  ;;  %v2178_v21 = vld [vmem:[#allocation13 + $0xc] ss:$16 sps:$4 sm:$0xff]  }
 0x115   :  { %1257 = vmatprep.subr.bf16.mxu1 %v2175_v20 }
 0x116   :  { %2039 = vmatpush3.bf16.msra.mxu0 %v2164_v13 }
 0x117   :  { %2040 = vmatprep.subr.bf16.mxu0 %v2496_v6 }
 0x11a   :  { %2041 = vmatpush3.bf16.msra.mxu0 %v2165_v14 }
 0x11b   :  { %2042 = vmatprep.subr.bf16.mxu0 %v2496_v6 }
 0x11e   :  { %2043 = vmatpush3.bf16.msra.mxu0 %v2166_v15 }
 0x11f   :  { %2044 = vmatprep.subr.bf16.mxu0 %v2496_v6 }
 0x122   :  { %2045 = vmatpush3.bf16.msra.mxu0 %v2167_v16 }
 0x123   :  { %1300 = vmatprep.subr.bf16.mxu0 %v2178_v21 }
 0x125   :  { %2047 = vmatmul.mubr.bf16.vlgmr.msra.gmra.mrb[8].mxu0 %v2168_v17 }
 0x1b8   :  { %v1900_v22 = vpop.f32.mrb[0].mxu0 }
 0x1b9   :  { %v1901_v24 = vpop.f32.mrb[1].mxu0 }
 0x1ba   :  { %v1902_v25 = vadd.f32 %v1901_v24, %v1900_v22  ;;  %v1903_v26 = vpop.f32.mrb[2].mxu0  ;;  %v1922_v27 = vpop.f32.mrb[0].mxu1  ;;  %v2173_v22 = vld [vmem:[#allocation13] ss:$16 sps:$4 sm:$0xff]   ;;  %v2181_v24 = vld [vmem:[#allocation13 + $0x24] ss:$16 sps:$4 sm:$0xff]  }
 0x1bb   :  { %v1904_v28 = vpop.f32.mrb[3].mxu0  ;;  %v1923_v31 = vpop.f32.mrb[1].mxu1 }
 0x1bc   :  { %v851_v29 = vadd.f32 %v1902_v25, %v1743_v23  ;;  %v1905_v30 = vadd.f32 %v1904_v28, %v1903_v26  ;;  %v1924_v32 = vadd.f32 %v1923_v31, %v1922_v27  ;;  %v1925_v33 = vpop.f32.mrb[2].mxu1  ;;  %v2184_v25 = vld [vmem:[#allocation13 + $0x2c] ss:$16 sps:$4 sm:$0xff]   ;;  %v2179_v26 = vld [vmem:[#allocation13 + $0x20] ss:$16 sps:$4 sm:$0xff]  }
 0x1bd   :  { %v1926_v35 = vpop.f32.mrb[3].mxu1  ;;  %v2182_v27 = vld [vmem:[#allocation13 + $0x28] ss:$16 sps:$4 sm:$0xff]   ;;  %v2187_v28 = vld [vmem:[#allocation13 + $0x44] ss:$16 sps:$4 sm:$0xff]  }
 0x1be   :  { %v854_v34 = vadd.f32 %v1905_v30, %v1743_v23  ;;  %v892_v36 = vadd.f32 %v1924_v32, %v851_v29  ;;  %v1927_v37 = vadd.f32 %v1926_v35, %v1925_v33  ;;  %v2176_v23 = vld [vmem:[#allocation13 + $0x8] ss:$16 sps:$4 sm:$0xff]   ;;  %v2190_v29 = vld [vmem:[#allocation13 + $0x4c] ss:$16 sps:$4 sm:$0xff]   ;;  %v2185_v30 = vld [vmem:[#allocation13 + $0x40] ss:$16 sps:$4 sm:$0xff]  }
 0x1bf   :  { %1301 = vmatpush1.bf16.msra.mxu0 %v2176_v23  ;;  %v2188_v31 = vld [vmem:[#allocation13 + $0x48] ss:$16 sps:$4 sm:$0xff]   ;;  %v2193_v32 = vld [vmem:[#allocation13 + $0x64] ss:$16 sps:$4 sm:$0xff]   ;;  %v2196_v33 = vld [vmem:[#allocation13 + $0x6c] ss:$16 sps:$4 sm:$0xff]  }
 0x1c0   :  { %v895_v38 = vadd.f32 %v1927_v37, %v854_v34  ;;  %1302 = vmatprep.subr.bf16.mxu0 %v2184_v25  ;;  %v2191_v34 = vld [vmem:[#allocation13 + $0x60] ss:$16 sps:$4 sm:$0xff]   ;;  %v2194_v35 = vld [vmem:[#allocation13 + $0x68] ss:$16 sps:$4 sm:$0xff]  }
 0x1c1   :  { %v2197_v37 = vld [vmem:[#allocation16 + $0x40] sm:$0xff]  }
 0x1c3   :  { %1303 = vmatpush1.bf16.msra.mxu0 %v2182_v27 }
 0x1c4   :  { %1304 = vmatprep.subr.bf16.mxu0 %v2190_v29 }
 0x1c7   :  { %1305 = vmatpush1.bf16.msra.mxu0 %v2188_v31 }
 0x1c8   :  { %1306 = vmatprep.subr.bf16.mxu0 %v2196_v33 }
 0x1cb   :  { %1307 = vmatpush1.bf16.msra.mxu0 %v2194_v35 }
 0x1d8   :  { %v1944_v39 = vpop.f32.mrb[4].mxu0 }
 0x1d9   :  { %v1945_v40 = vpop.f32.mrb[5].mxu0 }
 0x1da   :  { %v1946_v41 = vadd.f32 %v1945_v40, %v1944_v39  ;;  %v1947_v42 = vpop.f32.mrb[6].mxu0  ;;  %v1966_v43 = vpop.f32.mrb[4].mxu1 }
 0x1db   :  { %v1948_v44 = vpop.f32.mrb[7].mxu0  ;;  %v1967_v47 = vpop.f32.mrb[5].mxu1 }
 0x1dc   :  { %v933_v45 = vadd.f32 %v1946_v41, %v892_v36  ;;  %v1949_v46 = vadd.f32 %v1948_v44, %v1947_v42  ;;  %v1968_v48 = vadd.f32 %v1967_v47, %v1966_v43  ;;  %v1969_v49 = vpop.f32.mrb[6].mxu1  ;;  %v2498_v36 = vmov 0   ;;  %v2199_v47 = vld [vmem:[#allocation16] sm:$0xff]  }
 0x1dd   :  { %v1970_v51 = vpop.f32.mrb[7].mxu1  ;;  %1332 = vmatprep.mubr.bf16.mxu0 %v2498_v36 }
 0x1de   :  { %v936_v50 = vadd.f32 %v1949_v46, %v895_v38  ;;  %v1971_v52 = vadd.f32 %v1970_v51, %v1969_v49  ;;  %v974_v53 = vadd.f32 %v1968_v48, %v933_v45  ;;  %v2198_v38 = vld [vmem:[#allocation16 + $0xc0] sm:$0xff]   ;;  %v2202_v51 = vld [vmem:[#allocation16 + $0xc8] sm:$0xff]  }
 0x1df   :  { %2008 = vmatprep.subr.bf16.mxu0 %v2198_v38  ;;  %v2200_v48 = vld [vmem:[#allocation16 + $0x80] sm:$0xff]  }
 0x1e0   :  { %v977_v54 = vadd.f32 %v1971_v52, %v936_v50  ;;  %v2201_v50 = vld [vmem:[#allocation16 + $0x48] sm:$0xff]  }
 0x1e1   :  { %v2203_v52 = vld [vmem:[#allocation16 + $0x8] sm:$0xff]  }
 0x1f8   :  { %v1014_v55 = vpop.f32.mrb[8].mxu0 }
 0x1f9   :  { %v2680_v56 = vadd.f32 %v1014_v55, %v974_v53  ;;  %v2048_v57 = vpop.f32.mrb[9].mxu0  ;;  %v2204_v53 = vld [vmem:[#allocation16 + $0x88] sm:$0xff]   ;;  %v2206_v55 = vld [vmem:[#allocation16 + $0xd0] sm:$0xff]  }
 0x1fa   :  { %v1017_v58 = vpop.f32.mrb[10].mxu0  ;;  %v2208_v57 = vld [vmem:[#allocation16 + $0x90] sm:$0xff]  }
 0x1fb   :  { %v2682_v59 = vadd.f32 %v1017_v58, %v977_v54  ;;  %v2049_v60 = vpop.f32.mrb[11].mxu0  ;;  %v1021_v61 = vmax.f32 %v2680_v56, 0.0  ;;  %v2205_v54 = vld [vmem:[#allocation16 + $0x50] sm:$0xff]   ;;  %v2209_v58 = vld [vmem:[#allocation16 + $0x58] sm:$0xff]  }
 0x1fc   :  { %v2207_v56 = vld [vmem:[#allocation16 + $0x10] sm:$0xff]   ;;  %v2211_v60 = vld [vmem:[#allocation16 + $0x18] sm:$0xff]  }
 0x1fd   :  { %v1022_v62 = vmax.f32 %v2682_v59, 0.0  ;;  %v2210_v59 = vld [vmem:[#allocation16 + $0xd8] sm:$0xff]  }
 0x1ff   :  { %v1023_v63 = vpack.c.bf16 %v1022_v62, %v1021_v61 }
 0x201   :  { %1040 = vrot.lane.b32.xlu0 %v1023_v63, %s2482_s11  ;;  %v2214_v63 = vld [vmem:[#allocation16 + $0xe0] sm:$0xff]   ;;  %s1707_s11 = sshll.u32 %s2499_s9, 4  ;;  %s1708_s11 = int_to_ptr.vmem [resolvable:$true] %s1707_s11 }
 0x202   :  { %s2447_s26 = scalar_lea.vmem %s1708_s11, 256  ;;  %p2452_p13 = scmp.lt.s32.totalorder %s1708_s11, %s1708_s11 }
 0x203   :  { %p2448_p12 = scmp.ne.s32.totalorder %s1708_s11, %s2447_s26  ;;  %p2453_p0 = scmp.lt.s32.totalorder %s2447_s26, %s2447_s26 }
 0x205   :  { %p2454_p1 = por %p2453_p0, %p2452_p13 }
 0x207   :  { %p2455_p2 = pnand %p2454_p1, %p2448_p12 }
 0x273   :  { %v1041_v0 = vpop.permute.xlu0 %1040 }
 0x274   :  { %2059 = vmatmul.mubr.msk.bf16.vlgmr.msra.gmra.mrb[8].mxu1 %vm1066_vm1, %v1041_v0  ;;  %v2215_v0 = vld [vmem:[#allocation16 + $0x20] sm:$0xff]  }
 0x275   :  { %1258 = vmatpush1.bf16.msra.mxu1 %v2173_v22  ;;  %1289 = vmatprep.mubr.bf16.mxu1 %v2498_v36 }
 0x276   :  { %1259 = vmatprep.subr.bf16.mxu1 %v2181_v24 }
 0x279   :  { %1260 = vmatpush1.bf16.msra.mxu1 %v2179_v26 }
 0x27a   :  { %1261 = vmatprep.subr.bf16.mxu1 %v2187_v28 }
 0x27d   :  { %1262 = vmatpush1.bf16.msra.mxu1 %v2185_v30 }
 0x27e   :  { %1263 = vmatprep.subr.bf16.mxu1 %v2193_v32 }
 0x281   :  { %1264 = vmatpush1.bf16.msra.mxu1 %v2191_v34 }
 0x282   :  { %1986 = vmatprep.subr.bf16.mxu1 %v2197_v37 }
 0x347   :  { %v1104_v2 = vpop.f32.mrb[8].mxu1 }
 0x348   :  { %v1105_v3 = vadd.f32 %v1825_v1, %v1104_v2  ;;  %v2060_v4 = vpop.f32.mrb[9].mxu1  ;;  %v2217_v2 = vld [vmem:[#allocation16 + $0x68] sm:$0xff]  }
 0x349   :  { %v1107_v5 = vpop.f32.mrb[10].mxu1  ;;  %v2219_v4 = vld [vmem:[#allocation16 + $0x28] sm:$0xff]  }
 0x34a   :  { %v1108_v6 = vadd.f32 %v1825_v1, %v1107_v5  ;;  %v2061_v7 = vpop.f32.mrb[11].mxu1  ;;  %v1111_v8 = vsel %vm1066_vm1, %v1105_v3, -inf  ;;  %v2216_v1 = vld [vmem:[#allocation16 + $0xa0] sm:$0xff]   ;;  %v2220_v5 = vld [vmem:[#allocation16 + $0xa8] sm:$0xff]  }
 0x34b   :  { %1112 = vmax.xlane.f32.xlu0 %v1111_v8  ;;  %v2222_v7 = vld [vmem:[#allocation16 + $0xf0] sm:$0xff]  }
 0x34c   :  { %v1114_v9 = vsel %vm1066_vm1, %v1108_v6, -inf  ;;  %v2223_v8 = vld [vmem:[#allocation16 + $0x30] sm:$0xff]  }
 0x34d   :  { %1115 = vmax.xlane.f32.xlu1 %v1114_v9  ;;  %v2224_v9 = vld [vmem:[#allocation16 + $0xb0] sm:$0xff]  }
 0x3d8   :  { %v1113_v10 = vpop.xlane.xlu0 %1112 }
 0x3d9   :  { %v1117_v11 = vsub.f32 %v1105_v3, %v1113_v10  ;;  %v2218_v3 = vld [vmem:[#allocation16 + $0xe8] sm:$0xff]   ;;  %v2225_v10 = vld [vmem:[#allocation16 + $0x78] sm:$0xff]  }
 0x3da   :  { %v1116_v12 = vpop.xlane.xlu1 %1115 }
 0x3db   :  { %v1119_v13 = vmul.f32 1.442695, %v1117_v11  ;;  %v1118_v14 = vsub.f32 %v1108_v6, %v1116_v12  ;;  %v2221_v6 = vld [vmem:[#allocation16 + $0x70] sm:$0xff]   ;;  %v2226_v11 = vld [vmem:[#allocation16 + $0xf8] sm:$0xff]  }
 0x3dc   :  { %v2227_v12 = vld [vmem:[#allocation16 + $0x38] sm:$0xff]  }
 0x3dd   :  { %2229 = vpow2.f32 %v1119_v13  ;;  %v1121_v15 = vmul.f32 1.442695, %v1118_v14  ;;  %v2228_v13 = vld [vmem:[#allocation16 + $0xb8] sm:$0xff]   ;;  %v1154_v14 = vlaneseq }
 0x3df   :  { %2231 = vpow2.f32 %v1121_v15  ;;  %v1155_v15 = vshrl.u32 %v1154_v14, 7 }
 0x3e1   :  { %v1168_v20 = vsub.s32 3, %v1155_v15 }
 0x3e7   :  { %v2230_v16 = vpop.eup %2229 }
 0x3e8   :  { %v1123_v17 = vsel %vm1066_vm1, %v2230_v16, 0.0 }
 0x3e9   :  { %v2232_v18 = vpop.eup %2231  ;;  %1124 = vadd.xlane.f32.xlu1 %v1123_v17  ;;  %v1164_v17 = vsub.s32 2, %v1155_v15 }
 0x3ea   :  { %v1126_v19 = vsel %vm1066_vm1, %v2232_v18, 0.0 }
 0x3ed   :  { %1127 = vadd.xlane.f32.xlu1 %v1126_v19  ;;  %v1160_v19 = vsub.s32 1, %v1155_v15 }
 0x476   :  { %v1125_v39 = vpop.xlane.xlu1 %1124 }
 0x477   :  { %2233 = vrcp.f32 %v1125_v39 }
 0x47a   :  { %v1128_v40 = vpop.xlane.xlu1 %1127 }
 0x47b   :  { %2235 = vrcp.f32 %v1128_v40 }
 0x481   :  { %v2234_v41 = vpop.eup %2233 }
 0x482   :  { %v1131_v42 = vmul.f32 %v2234_v41, %v2230_v16  ;;  %v1156_v16 = vsub.s32 0, %v1155_v15 }
 0x484   :  { %v1133_v45 = vmul.f32 %v1131_v42, %v1021_v61  ;;  %v2212_v61 = vld [vmem:[#allocation16 + $0x98] sm:$0xff]  }
 0x485   :  { %v2236_v43 = vpop.eup %2235 }
 0x486   :  { %v1132_v44 = vmul.f32 %v2236_v43, %v2232_v18  ;;  %v1152_v18 = vld [vmem:[#allocation15] sm:$0xf] }
 0x487   :  { %v1157_v21 = vrot.slane %v1152_v18, %v1156_v16  ;;  %v1165_v22 = vrot.slane %v1152_v18, %v1164_v17  ;;  %v1161_v23 = vrot.slane %v1152_v18, %v1160_v19  ;;  %v1169_v24 = vrot.slane %v1152_v18, %v1168_v20 }
 0x488   :  { %v1134_v46 = vmul.f32 %v1132_v44, %v1022_v62  ;;  %v2213_v62 = vld [vmem:[#allocation16 + $0x60] sm:$0xff]  }
 0x48a   :  { %v1135_v49 = vpack.c.bf16 %v1134_v46, %v1133_v45 }
 0x48c   :  { %1847 = vmatmul.mubr.msk.bf16.vlgmr.msra.gmra.mrb[12].mxu1 %vm1066_vm1, %v1135_v49  ;;  %1848 = vmatmul.mubr.msk.bf16.vlgmr.msra.gmra.mrb[12].mxu0 %vm1066_vm1, %v1135_v49 }
 0x48d   :  { %1987 = vmatpush3.bf16.msra.mxu1 %v2199_v47  ;;  %2009 = vmatpush3.bf16.msra.mxu0 %v2200_v48 }
 0x48e   :  { %1988 = vmatprep.subr.bf16.mxu1 %v2201_v50  ;;  %2010 = vmatprep.subr.bf16.mxu0 %v2202_v51 }
 0x491   :  { %1989 = vmatpush3.bf16.msra.mxu1 %v2203_v52  ;;  %2011 = vmatpush3.bf16.msra.mxu0 %v2204_v53 }
 0x492   :  { %1990 = vmatprep.subr.bf16.mxu1 %v2205_v54  ;;  %2012 = vmatprep.subr.bf16.mxu0 %v2206_v55  ;;  %v1849_v55 = vld [vmem:[#allocation18] ss:$0 sm:$0xff] }
 0x495   :  { %1991 = vmatpush3.bf16.msra.mxu1 %v2207_v56  ;;  %2013 = vmatpush3.bf16.msra.mxu0 %v2208_v57 }
 0x496   :  { %1992 = vmatprep.subr.bf16.mxu1 %v2209_v58  ;;  %2014 = vmatprep.subr.bf16.mxu0 %v2210_v59 }
 0x499   :  { %1993 = vmatpush3.bf16.msra.mxu1 %v2211_v60  ;;  %2015 = vmatpush3.bf16.msra.mxu0 %v2212_v61 }
 0x49a   :  { %1994 = vmatprep.subr.bf16.mxu1 %v2213_v62  ;;  %2016 = vmatprep.subr.bf16.mxu0 %v2214_v63 }
 0x49d   :  { %1995 = vmatpush3.bf16.msra.mxu1 %v2215_v0  ;;  %2017 = vmatpush3.bf16.msra.mxu0 %v2216_v1 }
 0x49e   :  { %1996 = vmatprep.subr.bf16.mxu1 %v2217_v2  ;;  %2018 = vmatprep.subr.bf16.mxu0 %v2218_v3 }
 0x4a1   :  { %1997 = vmatpush3.bf16.msra.mxu1 %v2219_v4  ;;  %2019 = vmatpush3.bf16.msra.mxu0 %v2220_v5 }
 0x4a2   :  { %1998 = vmatprep.subr.bf16.mxu1 %v2221_v6  ;;  %2020 = vmatprep.subr.bf16.mxu0 %v2222_v7 }
 0x4a5   :  { %1999 = vmatpush3.bf16.msra.mxu1 %v2223_v8  ;;  %2021 = vmatpush3.bf16.msra.mxu0 %v2224_v9 }
 0x4a6   :  { %2000 = vmatprep.subr.bf16.mxu1 %v2225_v10  ;;  %2022 = vmatprep.subr.bf16.mxu0 %v2226_v11 }
 0x4a9   :  { %2001 = vmatpush3.bf16.msra.mxu1 %v2227_v12  ;;  %2023 = vmatpush3.bf16.msra.mxu0 %v2228_v13 }
 0x55f   :  { %v1291_v25 = vpop.f32.mrb[12].mxu1  ;;  %v1334_v26 = vpop.f32.mrb[12].mxu0 }
 0x560   :  { %v1292_v27 = vadd.f32 %v1291_v25, %v1157_v21  ;;  %v1335_v28 = vadd.f32 %v1334_v26, %v1165_v22  ;;  %v1293_v29 = vpop.f32.mrb[13].mxu1  ;;  %v1336_v30 = vpop.f32.mrb[13].mxu0 }
 0x561   :  { %v1294_v31 = vadd.f32 %v1293_v29, %v1161_v23  ;;  %v1337_v32 = vadd.f32 %v1336_v30, %v1169_v24  ;;  %v1295_v33 = vpop.f32.mrb[14].mxu1  ;;  %v1338_v34 = vpop.f32.mrb[14].mxu0 }
 0x562   :  { %v1296_v35 = vadd.f32 %v1295_v33, %v1157_v21  ;;  %v1339_v36 = vadd.f32 %v1338_v34, %v1165_v22  ;;  %v1297_v37 = vpop.f32.mrb[15].mxu1  ;;  %v1340_v38 = vpop.f32.mrb[15].mxu0  ;;  %v1343_v41 = vmax.f32 %v1292_v27, 0.0  ;;  %v1345_v42 = vmax.f32 %v1335_v28, 0.0 }
 0x563   :  { %v1298_v39 = vadd.f32 %v1297_v37, %v1161_v23  ;;  %v1341_v40 = vadd.f32 %v1340_v38, %v1169_v24  ;;  %v1344_v45 = vmax.f32 %v1294_v31, 0.0  ;;  %v1346_v46 = vmax.f32 %v1337_v32, 0.0 }
 0x564   :  { %v1347_v43 = vmax.f32 %v1296_v35, 0.0  ;;  %v1349_v44 = vmax.f32 %v1339_v36, 0.0 }
 0x565   :  { %v1348_v47 = vmax.f32 %v1298_v39, 0.0  ;;  %v1350_v48 = vmax.f32 %v1341_v40, 0.0 }
 0x566   :  { %v1351_v49 = vpack.c.bf16 %v1347_v43, %v1343_v41  ;;  %v1353_v50 = vpack.c.bf16 %v1349_v44, %v1345_v42 }
 0x567   :  { %v1352_v51 = vpack.c.bf16 %v1348_v47, %v1344_v45  ;;  %v1354_v52 = vpack.c.bf16 %v1350_v48, %v1346_v46 }
 0x569   :  { %1650 = vmatprep.mubr.bf16.mxu1 %v1352_v51  ;;  %1691 = vmatprep.mubr.bf16.mxu0 %v1354_v52 }
 0x56a   :  { %1651 = vmatmul.mubr.bf16.vlgmr.msra.gmra.mrb[16].mxu1 %v1351_v49  ;;  %1692 = vmatmul.mubr.bf16.vlgmr.msra.gmra.mrb[16].mxu0 %v1353_v50 }
 0x63d   :  { %v2002_v53 = vpop.f32.mrb[16].mxu1  ;;  %v2024_v54 = vpop.f32.mrb[16].mxu0 }
 0x63e   :  { %v2003_v56 = vpop.f32.mrb[17].mxu1  ;;  %v2025_v57 = vpop.f32.mrb[17].mxu0 }
 0x63f   :  { %v2004_v58 = vadd.f32 %v2003_v56, %v2002_v53  ;;  %v2026_v59 = vadd.f32 %v2025_v57, %v2024_v54  ;;  %v2005_v60 = vpop.f32.mrb[18].mxu1  ;;  %v2027_v61 = vpop.f32.mrb[18].mxu0 }
 0x640   :  { %v2006_v62 = vpop.f32.mrb[19].mxu1  ;;  %v2028_v63 = vpop.f32.mrb[19].mxu0 }
 0x641   :  { %v1653_v0 = vadd.f32 %v2004_v58, %v1849_v55  ;;  %v2007_v1 = vadd.f32 %v2006_v62, %v2005_v60  ;;  %v2029_v2 = vadd.f32 %v2028_v63, %v2027_v61 }
 0x643   :  { %v1694_v3 = vadd.f32 %v2026_v59, %v1653_v0  ;;  %v1656_v4 = vadd.f32 %v2007_v1, %v1849_v55 }
 0x645   :  { %1700 = vst [vmem:[#allocation19] sm:$0xff] %v1694_v3  ;;  %v1697_v5 = vadd.f32 %v2029_v2, %v1656_v4 }
 0x647   :  { %1701 = vst [vmem:[#allocation19 + $0x8] sm:$0xff] %v1697_v5 }
 0x648   :  { %2458 = shalt.err (!%p2455_p2)
}
 0x649   :  { %s2459_s29 = scalar_lea.hbm %s2724_s10, 256 }
 0x64a   :  { %p2460_p3 = scmp.ne.s32.totalorder %s2724_s10, %s2459_s29  ;;  %p2463_p4 = scmp.lt.u32.totalorder %s2459_s29, %s2724_s10 }
 0x64c   :  { %p2465_p5 = pnand %p2463_p4, %p2460_p3 }
 0x64e   :  { %2468 = shalt.err (!%p2465_p5)
}
 0x64f   :  { %s2500_s15 = smov 128   ;;  %s2501_s18 = smov 8  }
 0x650   :  { %1713 = dma.vmem_to_hbm [thread:$0]  %s1708_s11, 256, %s2724_s10, [#allocation6], %s2500_s15, %s2500_s15, %s2501_s18  }
 0x651   :  { %2479 = dma.done.wait [#allocation6], 256  }
 0x652   :  { %2480 = vsyncadd [#allocation6], 4294967040 }
 0x653   :  { %1717 = vsyncpa [#allocation5], 1 }
 0x654   :  { %1718 = vsyncpa [#allocation8], 1 }
 0x655   :  { %1719 = vsyncpa [#allocation11], 1 }
 0x656   :  { %1720 = vsyncpa [#allocation14], 1 }
 0x657   :  { %1721 = vsyncpa [#allocation17], 1 }
 0x658   :  { %1722 = vsyncpa [#allocation6], 1 }

</bundles_post_ra>
